<compile_context>
chip_gen: v7x
topology: tpu7x:2x2x1
jax: 0.10.0
libtpu: 0.0.40
codegen_flags: <defaults>
</compile_context>

<pallas_src>
from functools import partial
from math import floor

import jax
import jax.numpy as jnp
from jax import lax
from jax.experimental import pallas as pl
from jax.experimental.pallas import tpu as pltpu


def _round_up(a: int, b: int) -> int:
    return (a + b - 1) // b * b


# --------------------------------------------------------------------------- #
# Kernel
# --------------------------------------------------------------------------- #
def _lc2d_kernel(p_ref, w_ref, b_ref, o_ref, acc_ref):
    """One (L-tile, K-tile) grid step.

    p_ref:   (N, TK, TL)  im2col patches            (lane axis = locations)
    w_ref:   (O, TK, TL)  per-location weights
    b_ref:   (O, TL)      per-location bias
    o_ref:   (N, O, TL)   output block (written at the last K step only)
    acc_ref: (N, O, TL)   f32 VMEM accumulator (persists across the K axis)
    """
    n, tk, tl = p_ref.shape
    o_dim = w_ref.shape[0]
    n_chunks = tk // 8                       # TK is padded to a multiple of 8
    kt = pl.program_id(1)

    @pl.when(kt == 0)
    def _():
        acc_ref[...] = jnp.zeros_like(acc_ref)

    def k_chunk(k0, s8, nn, oo):
        # Full-width (8, TL) loads; the multiply-add stays 8 sublanes wide so
        # the cross-sublane (XLU) reduction happens only once per (n, o).
        pc = p_ref[nn, pl.ds(k0, 8), :].astype(jnp.float32)
        wc = w_ref[oo, pl.ds(k0, 8), :].astype(jnp.float32)
        return s8 + pc * wc

    for nn in range(n):
        for oo in range(o_dim):
            s8 = jnp.zeros((8, tl), jnp.float32)
            if n_chunks <= 8:
                # Short K tile: fully unroll (LLO-visible, no loop overhead).
                for c in range(n_chunks):
                    s8 = k_chunk(c * 8, s8, nn, oo)
            else:
                # Long K tile: bounded trace size / vreg pressure.
                s8 = lax.fori_loop(
                    0, n_chunks,
                    lambda c, s, nn=nn, oo=oo: k_chunk(
                        pl.multiple_of(c * 8, 8), s, nn, oo),
                    s8, unroll=8)
            # One XLU sublane-reduce + one lane-dense (1, TL) RMW per (n, o).
            acc_ref[nn, oo:oo + 1, :] += jnp.sum(s8, axis=0, keepdims=True)

    @pl.when(kt == pl.num_programs(1) - 1)
    def _():
        out = acc_ref[...] + b_ref[...].astype(jnp.float32)[None, :, :]
        o_ref[...] = out.astype(o_ref.dtype)


# --------------------------------------------------------------------------- #
# One-time parameter re-layout (hoisted out of the per-call path)
# --------------------------------------------------------------------------- #
def prepare_lc2d_params(weight, bias, *, stream_dtype=None):
    """Re-layout the per-location weights/bias once; reuse across calls.

    weight: (1, C, O, Ho, Wo, k, k) -> (O, Kp, Lp), K ordered (c, p, q)
    bias:   (1, O, Ho, Wo)          -> (O, Lp)      (kept in its own dtype)
    """
    _, C, O, Ho, Wo, k, k2 = weight.shape
    assert k == k2
    K, L = C * k * k, Ho * Wo
    Kp, Lp = _round_up(K, 8), _round_up(L, 128)
    w2 = weight[0].transpose(1, 0, 4, 5, 2, 3).reshape(O, K, L)   # (O, K, L)
    b2 = bias[0].reshape(O, L)                                    # (O, L)
    if stream_dtype is not None:
        w2 = w2.astype(stream_dtype)          # bandwidth win; accumulation stays f32
    w2 = jnp.pad(w2, ((0, 0), (0, Kp - K), (0, Lp - L)))
    b2 = jnp.pad(b2, ((0, 0), (0, Lp - L)))
    return w2, b2


# --------------------------------------------------------------------------- #
# Per-call path
# --------------------------------------------------------------------------- #
def lc2d_apply(x, w2, b2, *, kernel_size, stride=1, padding=0, stream_dtype=None,
               interpret=False):
    """x: (N, C, H, W); w2/b2 from prepare_lc2d_params. Returns (N, O, Ho, Wo)."""
    N, C, H, W = x.shape
    k, s, p = kernel_size, stride, padding
    Ho = floor((H + 2 * p - k) / s + 1)
    Wo = floor((W + 2 * p - k) / s + 1)
    K, L = C * k * k, Ho * Wo
    O, Kp, Lp = w2.shape
    assert Kp == _round_up(K, 8) and Lp == _round_up(L, 128)
    assert b2.shape == (O, Lp)

    # ---- glue (plain JAX): pad + im2col directly into the lane-dense layout.
    # TODO(synk): for large N, fuse the im2col into the kernel (x in pl.ANY +
    # manual window gather) instead of materializing the k^2-expanded patches.
    xp = jnp.pad(x, ((0, 0), (0, 0), (p, p), (p, p)))
    rows = jnp.arange(k)[:, None, None, None] + (jnp.arange(Ho) * s)[None, None, :, None]
    cols = jnp.arange(k)[None, :, None, None] + (jnp.arange(Wo) * s)[None, None, None, :]
    windows = xp[:, :, rows, cols]                    # (N, C, k, k, Ho, Wo)
    patches = windows.reshape(N, K, L)                # (N, K, L), K ordered (c, p, q)
    if stream_dtype is not None:
        patches = patches.astype(stream_dtype)
    patches = jnp.pad(patches, ((0, 0), (0, Kp - K), (0, Lp - L)))

    # ---- tiling: biggest lane tile that fits the VMEM budget; split K (second,
    # "arbitrary" grid axis) only when the whole-K block cannot fit.
    s_item = jnp.dtype(patches.dtype).itemsize
    s_sub = 8 * (4 // s_item)                         # sublane packing multiple
    o_item = jnp.dtype(x.dtype).itemsize
    b_item = jnp.dtype(b2.dtype).itemsize
    try:
        vmem_cap = int(pltpu.get_tpu_info().vmem_capacity_bytes)
    except Exception:
        vmem_cap = 64 * 1024 * 1024                   # conservative (v7x per-TC VMEM)
    budget = int(vmem_cap * 0.7)
    wbuf = 3                                          # charge deep weight pipeline up front

    def block_bytes(tk, tl):
        tkp = _round_up(tk, s_sub)
        total = 2 * N * tkp * tl * s_item                            # patches (2x buf)
        total += wbuf * O * tkp * tl * s_item                        # weights
        total += 2 * _round_up(O, 8 * (4 // b_item)) * tl * b_item   # bias
        total += 2 * N * _round_up(O, 8 * (4 // o_item)) * tl * o_item  # out (2x buf)
        total += N * _round_up(O, 8) * tl * 4                        # f32 acc scratch
        return total

    m = Lp // 128
    mk = Kp // 8
    tk_cands = [8 * t for t in range(mk, 0, -1) if mk % t == 0]      # divisors of Kp, desc
    d_cands = [d for d in range(m, 0, -1) if m % d == 0]             # divisors of m, desc

    tk, tl = 8, 128                                    # last-resort fallback
    found = False
    for d in d_cands:                                  # prefer the largest lane tile
        for cand_tk in tk_cands:                       # then the largest K tile
            if block_bytes(cand_tk, 128 * d) <= budget:
                tk, tl = cand_tk, 128 * d
                found = True
                break
        if found:
            break

    # Guarantee >= 2 L tiles when possible so both TensorCores of a dual-core
    # chip (v7x) get work from the "parallel" axis; on single-core chips the
    # cost is one extra ~0.35us grid step.
    if Lp // tl == 1 and m >= 2:
        d2 = max(d for d in range(1, m) if m % d == 0)   # largest proper divisor
        if 128 * d2 >= 256 or m == 2:
            tl = 128 * d2

    num_l = Lp // tl
    num_k = Kp // tk
    grid = (num_l, num_k)

    # Weights are the dominant HBM stream: deepen their pipeline when the grid
    # is deep enough for it to matter.
    # TODO(synk): for v5e, pre-reshape w2 to (num_l, O, Kp, tl) at prepare time
    # so each grid step reads one contiguous slab instead of O*Kp strided rows.
    w_spec = pl.BlockSpec((O, tk, tl), lambda l, kk: (0, kk, l))
    if num_l * num_k >= 3:
        try:
            w_spec = pl.BlockSpec((O, tk, tl), lambda l, kk: (0, kk, l),
                                  pipeline_mode=pl.Buffered(3))
        except Exception:
            pass  # fall back to default double-buffering

    out = pl.pallas_call(
        _lc2d_kernel,
        out_shape=jax.ShapeDtypeStruct((N, O, Lp), x.dtype),
        grid_spec=pltpu.PrefetchScalarGridSpec(
            num_scalar_prefetch=0,
            grid=grid,
            in_specs=[
                pl.BlockSpec((N, tk, tl), lambda l, kk: (0, kk, l)),
                w_spec,
                pl.BlockSpec((O, tl), lambda l, kk: (0, l)),
            ],
            out_specs=pl.BlockSpec((N, O, tl), lambda l, kk: (0, 0, l)),
            scratch_shapes=[pltpu.VMEM((N, O, tl), jnp.float32)],
        ),
        compiler_params=pltpu.CompilerParams(
            dimension_semantics=("parallel", "arbitrary"),
            vmem_limit_bytes=min(int(vmem_cap * 0.9), 100 * 1024 * 1024),
        ),
        interpret=interpret,
    )(patches, w2, b2)

    # (N, O, Lp) -> (N, O, Ho, Wo): drop L padding; no transpose needed.
    return out[:, :, :L].reshape(N, O, Ho, Wo)


def locally_connected_2d(x, weight, bias, *, kernel_size, stride=1, padding=0,
                         stream_dtype=None):
    """One-shot wrapper. Prefer prepare_lc2d_params + lc2d_apply for repeated
    calls so the weight re-layout is not paid on every forward."""
    w2, b2 = prepare_lc2d_params(weight, bias, stream_dtype=stream_dtype)
    return lc2d_apply(x, w2, b2, kernel_size=kernel_size, stride=stride,
                      padding=padding, stream_dtype=stream_dtype)


if __name__ == "__main__":
    # Small shapes consistent with the module's forward.
    N, C, O = 2, 4, 8
    H = W = 16
    k, s, p = 3, 1, 1
    Ho = floor((H + 2 * p - k) / s + 1)
    Wo = floor((W + 2 * p - k) / s + 1)

    key = jax.random.PRNGKey(0)
    kx, kw, kb = jax.random.split(key, 3)
    x = jax.random.normal(kx, (N, C, H, W), jnp.float32)
    weight = jax.random.normal(kw, (1, C, O, Ho, Wo, k, k), jnp.float32)
    bias = jax.random.normal(kb, (1, O, Ho, Wo), jnp.float32)

    # Weight re-layout done once (cached); the per-call path is x -> im2col -> kernel.
    w2, b2 = prepare_lc2d_params(weight, bias)
    apply_fn = jax.jit(partial(lc2d_apply, kernel_size=k, stride=s, padding=p))
    y = jax.block_until_ready(apply_fn(x, w2, b2))
    assert y.shape == (N, O, Ho, Wo)

    # Pure-JAX reference (mirrors the PyTorch forward exactly).
    xp = jnp.pad(x, ((0, 0), (0, 0), (p, p), (p, p)))
    ih = (jnp.arange(Ho) * s)[:, None] + jnp.arange(k)[None, :]
    iw = (jnp.arange(Wo) * s)[:, None] + jnp.arange(k)[None, :]
    windows = xp[:, :, ih[:, None, :, None], iw[None, :, None, :]]      # (N,C,Ho,Wo,k,k)
    ref = jnp.einsum("ncijpq,coijpq->noij", windows, weight[0]) + bias   # broadcasts bias

    assert jnp.allclose(y, ref, atol=1e-4, rtol=1e-4), float(jnp.max(jnp.abs(y - ref)))
    print("KERNEL_OK")
</pallas_src>

<mosaic_0001>
module attributes {stable_mosaic.version = 11 : i64} {
  func.func @_lc2d_kernel(%arg0: i32, %arg1: i32, %arg2: memref<2x40x128xf32, #tpu.memory_space<vmem>>, %arg3: memref<8x40x128xf32, #tpu.memory_space<vmem>>, %arg4: memref<8x128xf32, #tpu.memory_space<vmem>>, %arg5: memref<2x8x128xf32, #tpu.memory_space<vmem>>, %arg6: memref<2x8x128xf32, #tpu.memory_space<vmem>>) attributes {dimension_semantics = [#tpu.dimension_semantics<parallel>, #tpu.dimension_semantics<arbitrary>], iteration_bounds = array<i64: 2, 1>, scalar_prefetch = 0 : i64, scratch_operands = 1 : i64, tpu.core_type = #tpu.core_type<tc>, window_params = [{transform_indices = @transform_0, window_bounds = array<i64: 2, 40, 128>}, {transform_indices = @transform_1, window_bounds = array<i64: 8, 40, 128>}, {transform_indices = @transform_2, window_bounds = array<i64: 8, 128>}, {transform_indices = @transform_3, window_bounds = array<i64: 2, 8, 128>}]} {
    %c0_i32 = arith.constant 0 : i32
    %0 = arith.cmpi eq, %arg1, %c0_i32 : i32
    %1 = arith.extui %0 : i1 to i32
    %c0_i32_0 = arith.constant 0 : i32
    %2 = arith.cmpi ne, %1, %c0_i32_0 : i32
    scf.if %2 {
      %cst_598 = arith.constant 0.000000e+00 : f32
      %630 = vector.broadcast %cst_598 : f32 to vector<2x8x128xf32>
      %c0_599 = arith.constant 0 : index
      %c0_600 = arith.constant 0 : index
      %c0_601 = arith.constant 0 : index
      %631 = vector.load %arg6[%c0_599, %c0_600, %c0_601] : memref<2x8x128xf32, #tpu.memory_space<vmem>>, vector<2x8x128xf32>
      tpu.vector_store %arg6[%c0_599, %c0_600, %c0_601], %630 {strides = array<i32>} : memref<2x8x128xf32, #tpu.memory_space<vmem>>, vector<2x8x128xf32>,
    } else {
    }
    %cst = arith.constant 0.000000e+00 : f32
    %3 = vector.broadcast %cst : f32 to vector<8x128xf32>
    %c0 = arith.constant 0 : index
    %c0_1 = arith.constant 0 : index
    %c0_2 = arith.constant 0 : index
    %4 = vector.load %arg2[%c0, %c0_1, %c0_2] : memref<2x40x128xf32, #tpu.memory_space<vmem>>, vector<1x8x128xf32>
    %5 = vector.shape_cast %4 : vector<1x8x128xf32> to vector<8x128xf32>
    %c0_3 = arith.constant 0 : index
    %c0_4 = arith.constant 0 : index
    %c0_5 = arith.constant 0 : index
    %6 = vector.load %arg3[%c0_3, %c0_4, %c0_5] : memref<8x40x128xf32, #tpu.memory_space<vmem>>, vector<1x8x128xf32>
    %7 = vector.shape_cast %6 : vector<1x8x128xf32> to vector<8x128xf32>
    %8 = arith.mulf %5, %7 : vector<8x128xf32>
    %9 = arith.addf %3, %8 : vector<8x128xf32>
    %c0_6 = arith.constant 0 : index
    %c8 = arith.constant 8 : index
    %c0_7 = arith.constant 0 : index
    %10 = vector.load %arg2[%c0_6, %c8, %c0_7] : memref<2x40x128xf32, #tpu.memory_space<vmem>>, vector<1x8x128xf32>
    %11 = vector.shape_cast %10 : vector<1x8x128xf32> to vector<8x128xf32>
    %c0_8 = arith.constant 0 : index
    %c8_9 = arith.constant 8 : index
    %c0_10 = arith.constant 0 : index
    %12 = vector.load %arg3[%c0_8, %c8_9, %c0_10] : memref<8x40x128xf32, #tpu.memory_space<vmem>>, vector<1x8x128xf32>
    %13 = vector.shape_cast %12 : vector<1x8x128xf32> to vector<8x128xf32>
    %14 = arith.mulf %11, %13 : vector<8x128xf32>
    %15 = arith.addf %9, %14 : vector<8x128xf32>
    %c0_11 = arith.constant 0 : index
    %c16 = arith.constant 16 : index
    %c0_12 = arith.constant 0 : index
    %16 = vector.load %arg2[%c0_11, %c16, %c0_12] : memref<2x40x128xf32, #tpu.memory_space<vmem>>, vector<1x8x128xf32>
    %17 = vector.shape_cast %16 : vector<1x8x128xf32> to vector<8x128xf32>
    %c0_13 = arith.constant 0 : index
    %c16_14 = arith.constant 16 : index
    %c0_15 = arith.constant 0 : index
    %18 = vector.load %arg3[%c0_13, %c16_14, %c0_15] : memref<8x40x128xf32, #tpu.memory_space<vmem>>, vector<1x8x128xf32>
    %19 = vector.shape_cast %18 : vector<1x8x128xf32> to vector<8x128xf32>
    %20 = arith.mulf %17, %19 : vector<8x128xf32>
    %21 = arith.addf %15, %20 : vector<8x128xf32>
    %c0_16 = arith.constant 0 : index
    %c24 = arith.constant 24 : index
    %c0_17 = arith.constant 0 : index
    %22 = vector.load %arg2[%c0_16, %c24, %c0_17] : memref<2x40x128xf32, #tpu.memory_space<vmem>>, vector<1x8x128xf32>
    %23 = vector.shape_cast %22 : vector<1x8x128xf32> to vector<8x128xf32>
    %c0_18 = arith.constant 0 : index
    %c24_19 = arith.constant 24 : index
    %c0_20 = arith.constant 0 : index
    %24 = vector.load %arg3[%c0_18, %c24_19, %c0_20] : memref<8x40x128xf32, #tpu.memory_space<vmem>>, vector<1x8x128xf32>
    %25 = vector.shape_cast %24 : vector<1x8x128xf32> to vector<8x128xf32>
    %26 = arith.mulf %23, %25 : vector<8x128xf32>
    %27 = arith.addf %21, %26 : vector<8x128xf32>
    %c0_21 = arith.constant 0 : index
    %c32 = arith.constant 32 : index
    %c0_22 = arith.constant 0 : index
    %28 = vector.load %arg2[%c0_21, %c32, %c0_22] : memref<2x40x128xf32, #tpu.memory_space<vmem>>, vector<1x8x128xf32>
    %29 = vector.shape_cast %28 : vector<1x8x128xf32> to vector<8x128xf32>
    %c0_23 = arith.constant 0 : index
    %c32_24 = arith.constant 32 : index
    %c0_25 = arith.constant 0 : index
    %30 = vector.load %arg3[%c0_23, %c32_24, %c0_25] : memref<8x40x128xf32, #tpu.memory_space<vmem>>, vector<1x8x128xf32>
    %31 = vector.shape_cast %30 : vector<1x8x128xf32> to vector<8x128xf32>
    %32 = arith.mulf %29, %31 : vector<8x128xf32>
    %33 = arith.addf %27, %32 : vector<8x128xf32>
    %c0_26 = arith.constant 0 : index
    %c0_27 = arith.constant 0 : index
    %c0_28 = arith.constant 0 : index
    %34 = vector.load %arg6[%c0_26, %c0_27, %c0_28] : memref<2x8x128xf32, #tpu.memory_space<vmem>>, vector<1x1x128xf32>
    %35 = vector.shape_cast %34 : vector<1x1x128xf32> to vector<1x128xf32>
    %cst_29 = arith.constant dense<0.000000e+00> : vector<128xf32>
    %36 = vector.multi_reduction <add>, %33, %cst_29 [0] : vector<8x128xf32> to vector<128xf32>
    %37 = vector.shape_cast %36 : vector<128xf32> to vector<1x128xf32>
    %38 = arith.addf %35, %37 : vector<1x128xf32>
    %c0_30 = arith.constant 0 : index
    %c0_31 = arith.constant 0 : index
    %c0_32 = arith.constant 0 : index
    %39 = vector.load %arg6[%c0_30, %c0_31, %c0_32] : memref<2x8x128xf32, #tpu.memory_space<vmem>>, vector<1x1x128xf32>
    %40 = vector.shape_cast %39 : vector<1x1x128xf32> to vector<1x128xf32>
    %41 = vector.shape_cast %38 : vector<1x128xf32> to vector<1x1x128xf32>
    tpu.vector_store %arg6[%c0_30, %c0_31, %c0_32], %41 {strides = array<i32>} : memref<2x8x128xf32, #tpu.memory_space<vmem>>, vector<1x1x128xf32>,
    %cst_33 = arith.constant 0.000000e+00 : f32
    %42 = vector.broadcast %cst_33 : f32 to vector<8x128xf32>
    %c0_34 = arith.constant 0 : index
    %c0_35 = arith.constant 0 : index
    %c0_36 = arith.constant 0 : index
    %43 = vector.load %arg2[%c0_34, %c0_35, %c0_36] : memref<2x40x128xf32, #tpu.memory_space<vmem>>, vector<1x8x128xf32>
    %44 = vector.shape_cast %43 : vector<1x8x128xf32> to vector<8x128xf32>
    %c1 = arith.constant 1 : index
    %c0_37 = arith.constant 0 : index
    %c0_38 = arith.constant 0 : index
    %45 = vector.load %arg3[%c1, %c0_37, %c0_38] : memref<8x40x128xf32, #tpu.memory_space<vmem>>, vector<1x8x128xf32>
    %46 = vector.shape_cast %45 : vector<1x8x128xf32> to vector<8x128xf32>
    %47 = arith.mulf %44, %46 : vector<8x128xf32>
    %48 = arith.addf %42, %47 : vector<8x128xf32>
    %c0_39 = arith.constant 0 : index
    %c8_40 = arith.constant 8 : index
    %c0_41 = arith.constant 0 : index
    %49 = vector.load %arg2[%c0_39, %c8_40, %c0_41] : memref<2x40x128xf32, #tpu.memory_space<vmem>>, vector<1x8x128xf32>
    %50 = vector.shape_cast %49 : vector<1x8x128xf32> to vector<8x128xf32>
    %c1_42 = arith.constant 1 : index
    %c8_43 = arith.constant 8 : index
    %c0_44 = arith.constant 0 : index
    %51 = vector.load %arg3[%c1_42, %c8_43, %c0_44] : memref<8x40x128xf32, #tpu.memory_space<vmem>>, vector<1x8x128xf32>
    %52 = vector.shape_cast %51 : vector<1x8x128xf32> to vector<8x128xf32>
    %53 = arith.mulf %50, %52 : vector<8x128xf32>
    %54 = arith.addf %48, %53 : vector<8x128xf32>
    %c0_45 = arith.constant 0 : index
    %c16_46 = arith.constant 16 : index
    %c0_47 = arith.constant 0 : index
    %55 = vector.load %arg2[%c0_45, %c16_46, %c0_47] : memref<2x40x128xf32, #tpu.memory_space<vmem>>, vector<1x8x128xf32>
    %56 = vector.shape_cast %55 : vector<1x8x128xf32> to vector<8x128xf32>
    %c1_48 = arith.constant 1 : index
    %c16_49 = arith.constant 16 : index
    %c0_50 = arith.constant 0 : index
    %57 = vector.load %arg3[%c1_48, %c16_49, %c0_50] : memref<8x40x128xf32, #tpu.memory_space<vmem>>, vector<1x8x128xf32>
    %58 = vector.shape_cast %57 : vector<1x8x128xf32> to vector<8x128xf32>
    %59 = arith.mulf %56, %58 : vector<8x128xf32>
    %60 = arith.addf %54, %59 : vector<8x128xf32>
    %c0_51 = arith.constant 0 : index
    %c24_52 = arith.constant 24 : index
    %c0_53 = arith.constant 0 : index
    %61 = vector.load %arg2[%c0_51, %c24_52, %c0_53] : memref<2x40x128xf32, #tpu.memory_space<vmem>>, vector<1x8x128xf32>
    %62 = vector.shape_cast %61 : vector<1x8x128xf32> to vector<8x128xf32>
    %c1_54 = arith.constant 1 : index
    %c24_55 = arith.constant 24 : index
    %c0_56 = arith.constant 0 : index
    %63 = vector.load %arg3[%c1_54, %c24_55, %c0_56] : memref<8x40x128xf32, #tpu.memory_space<vmem>>, vector<1x8x128xf32>
    %64 = vector.shape_cast %63 : vector<1x8x128xf32> to vector<8x128xf32>
    %65 = arith.mulf %62, %64 : vector<8x128xf32>
    %66 = arith.addf %60, %65 : vector<8x128xf32>
    %c0_57 = arith.constant 0 : index
    %c32_58 = arith.constant 32 : index
    %c0_59 = arith.constant 0 : index
    %67 = vector.load %arg2[%c0_57, %c32_58, %c0_59] : memref<2x40x128xf32, #tpu.memory_space<vmem>>, vector<1x8x128xf32>
    %68 = vector.shape_cast %67 : vector<1x8x128xf32> to vector<8x128xf32>
    %c1_60 = arith.constant 1 : index
    %c32_61 = arith.constant 32 : index
    %c0_62 = arith.constant 0 : index
    %69 = vector.load %arg3[%c1_60, %c32_61, %c0_62] : memref<8x40x128xf32, #tpu.memory_space<vmem>>, vector<1x8x128xf32>
    %70 = vector.shape_cast %69 : vector<1x8x128xf32> to vector<8x128xf32>
    %71 = arith.mulf %68, %70 : vector<8x128xf32>
    %72 = arith.addf %66, %71 : vector<8x128xf32>
    %c0_63 = arith.constant 0 : index
    %c1_64 = arith.constant 1 : index
    %c0_65 = arith.constant 0 : index
    %73 = vector.load %arg6[%c0_63, %c1_64, %c0_65] : memref<2x8x128xf32, #tpu.memory_space<vmem>>, vector<1x1x128xf32>
    %74 = vector.shape_cast %73 : vector<1x1x128xf32> to vector<1x128xf32>
    %cst_66 = arith.constant dense<0.000000e+00> : vector<128xf32>
    %75 = vector.multi_reduction <add>, %72, %cst_66 [0] : vector<8x128xf32> to vector<128xf32>
    %76 = vector.shape_cast %75 : vector<128xf32> to vector<1x128xf32>
    %77 = arith.addf %74, %76 : vector<1x128xf32>
    %c0_67 = arith.constant 0 : index
    %c1_68 = arith.constant 1 : index
    %c0_69 = arith.constant 0 : index
    %78 = vector.load %arg6[%c0_67, %c1_68, %c0_69] : memref<2x8x128xf32, #tpu.memory_space<vmem>>, vector<1x1x128xf32>
    %79 = vector.shape_cast %78 : vector<1x1x128xf32> to vector<1x128xf32>
    %80 = vector.shape_cast %77 : vector<1x128xf32> to vector<1x1x128xf32>
    tpu.vector_store %arg6[%c0_67, %c1_68, %c0_69], %80 {strides = array<i32>} : memref<2x8x128xf32, #tpu.memory_space<vmem>>, vector<1x1x128xf32>,
    %cst_70 = arith.constant 0.000000e+00 : f32
    %81 = vector.broadcast %cst_70 : f32 to vector<8x128xf32>
    %c0_71 = arith.constant 0 : index
    %c0_72 = arith.constant 0 : index
    %c0_73 = arith.constant 0 : index
    %82 = vector.load %arg2[%c0_71, %c0_72, %c0_73] : memref<2x40x128xf32, #tpu.memory_space<vmem>>, vector<1x8x128xf32>
    %83 = vector.shape_cast %82 : vector<1x8x128xf32> to vector<8x128xf32>
    %c2 = arith.constant 2 : index
    %c0_74 = arith.constant 0 : index
    %c0_75 = arith.constant 0 : index
    %84 = vector.load %arg3[%c2, %c0_74, %c0_75] : memref<8x40x128xf32, #tpu.memory_space<vmem>>, vector<1x8x128xf32>
    %85 = vector.shape_cast %84 : vector<1x8x128xf32> to vector<8x128xf32>
    %86 = arith.mulf %83, %85 : vector<8x128xf32>
    %87 = arith.addf %81, %86 : vector<8x128xf32>
    %c0_76 = arith.constant 0 : index
    %c8_77 = arith.constant 8 : index
    %c0_78 = arith.constant 0 : index
    %88 = vector.load %arg2[%c0_76, %c8_77, %c0_78] : memref<2x40x128xf32, #tpu.memory_space<vmem>>, vector<1x8x128xf32>
    %89 = vector.shape_cast %88 : vector<1x8x128xf32> to vector<8x128xf32>
    %c2_79 = arith.constant 2 : index
    %c8_80 = arith.constant 8 : index
    %c0_81 = arith.constant 0 : index
    %90 = vector.load %arg3[%c2_79, %c8_80, %c0_81] : memref<8x40x128xf32, #tpu.memory_space<vmem>>, vector<1x8x128xf32>
    %91 = vector.shape_cast %90 : vector<1x8x128xf32> to vector<8x128xf32>
    %92 = arith.mulf %89, %91 : vector<8x128xf32>
    %93 = arith.addf %87, %92 : vector<8x128xf32>
    %c0_82 = arith.constant 0 : index
    %c16_83 = arith.constant 16 : index
    %c0_84 = arith.constant 0 : index
    %94 = vector.load %arg2[%c0_82, %c16_83, %c0_84] : memref<2x40x128xf32, #tpu.memory_space<vmem>>, vector<1x8x128xf32>
    %95 = vector.shape_cast %94 : vector<1x8x128xf32> to vector<8x128xf32>
    %c2_85 = arith.constant 2 : index
    %c16_86 = arith.constant 16 : index
    %c0_87 = arith.constant 0 : index
    %96 = vector.load %arg3[%c2_85, %c16_86, %c0_87] : memref<8x40x128xf32, #tpu.memory_space<vmem>>, vector<1x8x128xf32>
    %97 = vector.shape_cast %96 : vector<1x8x128xf32> to vector<8x128xf32>
    %98 = arith.mulf %95, %97 : vector<8x128xf32>
    %99 = arith.addf %93, %98 : vector<8x128xf32>
    %c0_88 = arith.constant 0 : index
    %c24_89 = arith.constant 24 : index
    %c0_90 = arith.constant 0 : index
    %100 = vector.load %arg2[%c0_88, %c24_89, %c0_90] : memref<2x40x128xf32, #tpu.memory_space<vmem>>, vector<1x8x128xf32>
    %101 = vector.shape_cast %100 : vector<1x8x128xf32> to vector<8x128xf32>
    %c2_91 = arith.constant 2 : index
    %c24_92 = arith.constant 24 : index
    %c0_93 = arith.constant 0 : index
    %102 = vector.load %arg3[%c2_91, %c24_92, %c0_93] : memref<8x40x128xf32, #tpu.memory_space<vmem>>, vector<1x8x128xf32>
    %103 = vector.shape_cast %102 : vector<1x8x128xf32> to vector<8x128xf32>
    %104 = arith.mulf %101, %103 : vector<8x128xf32>
    %105 = arith.addf %99, %104 : vector<8x128xf32>
    %c0_94 = arith.constant 0 : index
    %c32_95 = arith.constant 32 : index
    %c0_96 = arith.constant 0 : index
    %106 = vector.load %arg2[%c0_94, %c32_95, %c0_96] : memref<2x40x128xf32, #tpu.memory_space<vmem>>, vector<1x8x128xf32>
    %107 = vector.shape_cast %106 : vector<1x8x128xf32> to vector<8x128xf32>
    %c2_97 = arith.constant 2 : index
    %c32_98 = arith.constant 32 : index
    %c0_99 = arith.constant 0 : index
    %108 = vector.load %arg3[%c2_97, %c32_98, %c0_99] : memref<8x40x128xf32, #tpu.memory_space<vmem>>, vector<1x8x128xf32>
    %109 = vector.shape_cast %108 : vector<1x8x128xf32> to vector<8x128xf32>
    %110 = arith.mulf %107, %109 : vector<8x128xf32>
    %111 = arith.addf %105, %110 : vector<8x128xf32>
    %c0_100 = arith.constant 0 : index
    %c2_101 = arith.constant 2 : index
    %c0_102 = arith.constant 0 : index
    %112 = vector.load %arg6[%c0_100, %c2_101, %c0_102] : memref<2x8x128xf32, #tpu.memory_space<vmem>>, vector<1x1x128xf32>
    %113 = vector.shape_cast %112 : vector<1x1x128xf32> to vector<1x128xf32>
    %cst_103 = arith.constant dense<0.000000e+00> : vector<128xf32>
    %114 = vector.multi_reduction <add>, %111, %cst_103 [0] : vector<8x128xf32> to vector<128xf32>
    %115 = vector.shape_cast %114 : vector<128xf32> to vector<1x128xf32>
    %116 = arith.addf %113, %115 : vector<1x128xf32>
    %c0_104 = arith.constant 0 : index
    %c2_105 = arith.constant 2 : index
    %c0_106 = arith.constant 0 : index
    %117 = vector.load %arg6[%c0_104, %c2_105, %c0_106] : memref<2x8x128xf32, #tpu.memory_space<vmem>>, vector<1x1x128xf32>
    %118 = vector.shape_cast %117 : vector<1x1x128xf32> to vector<1x128xf32>
    %119 = vector.shape_cast %116 : vector<1x128xf32> to vector<1x1x128xf32>
    tpu.vector_store %arg6[%c0_104, %c2_105, %c0_106], %119 {strides = array<i32>} : memref<2x8x128xf32, #tpu.memory_space<vmem>>, vector<1x1x128xf32>,
    %cst_107 = arith.constant 0.000000e+00 : f32
    %120 = vector.broadcast %cst_107 : f32 to vector<8x128xf32>
    %c0_108 = arith.constant 0 : index
    %c0_109 = arith.constant 0 : index
    %c0_110 = arith.constant 0 : index
    %121 = vector.load %arg2[%c0_108, %c0_109, %c0_110] : memref<2x40x128xf32, #tpu.memory_space<vmem>>, vector<1x8x128xf32>
    %122 = vector.shape_cast %121 : vector<1x8x128xf32> to vector<8x128xf32>
    %c3 = arith.constant 3 : index
    %c0_111 = arith.constant 0 : index
    %c0_112 = arith.constant 0 : index
    %123 = vector.load %arg3[%c3, %c0_111, %c0_112] : memref<8x40x128xf32, #tpu.memory_space<vmem>>, vector<1x8x128xf32>
    %124 = vector.shape_cast %123 : vector<1x8x128xf32> to vector<8x128xf32>
    %125 = arith.mulf %122, %124 : vector<8x128xf32>
    %126 = arith.addf %120, %125 : vector<8x128xf32>
    %c0_113 = arith.constant 0 : index
    %c8_114 = arith.constant 8 : index
    %c0_115 = arith.constant 0 : index
    %127 = vector.load %arg2[%c0_113, %c8_114, %c0_115] : memref<2x40x128xf32, #tpu.memory_space<vmem>>, vector<1x8x128xf32>
    %128 = vector.shape_cast %127 : vector<1x8x128xf32> to vector<8x128xf32>
    %c3_116 = arith.constant 3 : index
    %c8_117 = arith.constant 8 : index
    %c0_118 = arith.constant 0 : index
    %129 = vector.load %arg3[%c3_116, %c8_117, %c0_118] : memref<8x40x128xf32, #tpu.memory_space<vmem>>, vector<1x8x128xf32>
    %130 = vector.shape_cast %129 : vector<1x8x128xf32> to vector<8x128xf32>
    %131 = arith.mulf %128, %130 : vector<8x128xf32>
    %132 = arith.addf %126, %131 : vector<8x128xf32>
    %c0_119 = arith.constant 0 : index
    %c16_120 = arith.constant 16 : index
    %c0_121 = arith.constant 0 : index
    %133 = vector.load %arg2[%c0_119, %c16_120, %c0_121] : memref<2x40x128xf32, #tpu.memory_space<vmem>>, vector<1x8x128xf32>
    %134 = vector.shape_cast %133 : vector<1x8x128xf32> to vector<8x128xf32>
    %c3_122 = arith.constant 3 : index
    %c16_123 = arith.constant 16 : index
    %c0_124 = arith.constant 0 : index
    %135 = vector.load %arg3[%c3_122, %c16_123, %c0_124] : memref<8x40x128xf32, #tpu.memory_space<vmem>>, vector<1x8x128xf32>
    %136 = vector.shape_cast %135 : vector<1x8x128xf32> to vector<8x128xf32>
    %137 = arith.mulf %134, %136 : vector<8x128xf32>
    %138 = arith.addf %132, %137 : vector<8x128xf32>
    %c0_125 = arith.constant 0 : index
    %c24_126 = arith.constant 24 : index
    %c0_127 = arith.constant 0 : index
    %139 = vector.load %arg2[%c0_125, %c24_126, %c0_127] : memref<2x40x128xf32, #tpu.memory_space<vmem>>, vector<1x8x128xf32>
    %140 = vector.shape_cast %139 : vector<1x8x128xf32> to vector<8x128xf32>
    %c3_128 = arith.constant 3 : index
    %c24_129 = arith.constant 24 : index
    %c0_130 = arith.constant 0 : index
    %141 = vector.load %arg3[%c3_128, %c24_129, %c0_130] : memref<8x40x128xf32, #tpu.memory_space<vmem>>, vector<1x8x128xf32>
    %142 = vector.shape_cast %141 : vector<1x8x128xf32> to vector<8x128xf32>
    %143 = arith.mulf %140, %142 : vector<8x128xf32>
    %144 = arith.addf %138, %143 : vector<8x128xf32>
    %c0_131 = arith.constant 0 : index
    %c32_132 = arith.constant 32 : index
    %c0_133 = arith.constant 0 : index
    %145 = vector.load %arg2[%c0_131, %c32_132, %c0_133] : memref<2x40x128xf32, #tpu.memory_space<vmem>>, vector<1x8x128xf32>
    %146 = vector.shape_cast %145 : vector<1x8x128xf32> to vector<8x128xf32>
    %c3_134 = arith.constant 3 : index
    %c32_135 = arith.constant 32 : index
    %c0_136 = arith.constant 0 : index
    %147 = vector.load %arg3[%c3_134, %c32_135, %c0_136] : memref<8x40x128xf32, #tpu.memory_space<vmem>>, vector<1x8x128xf32>
    %148 = vector.shape_cast %147 : vector<1x8x128xf32> to vector<8x128xf32>
    %149 = arith.mulf %146, %148 : vector<8x128xf32>
    %150 = arith.addf %144, %149 : vector<8x128xf32>
    %c0_137 = arith.constant 0 : index
    %c3_138 = arith.constant 3 : index
    %c0_139 = arith.constant 0 : index
    %151 = vector.load %arg6[%c0_137, %c3_138, %c0_139] : memref<2x8x128xf32, #tpu.memory_space<vmem>>, vector<1x1x128xf32>
    %152 = vector.shape_cast %151 : vector<1x1x128xf32> to vector<1x128xf32>
    %cst_140 = arith.constant dense<0.000000e+00> : vector<128xf32>
    %153 = vector.multi_reduction <add>, %150, %cst_140 [0] : vector<8x128xf32> to vector<128xf32>
    %154 = vector.shape_cast %153 : vector<128xf32> to vector<1x128xf32>
    %155 = arith.addf %152, %154 : vector<1x128xf32>
    %c0_141 = arith.constant 0 : index
    %c3_142 = arith.constant 3 : index
    %c0_143 = arith.constant 0 : index
    %156 = vector.load %arg6[%c0_141, %c3_142, %c0_143] : memref<2x8x128xf32, #tpu.memory_space<vmem>>, vector<1x1x128xf32>
    %157 = vector.shape_cast %156 : vector<1x1x128xf32> to vector<1x128xf32>
    %158 = vector.shape_cast %155 : vector<1x128xf32> to vector<1x1x128xf32>
    tpu.vector_store %arg6[%c0_141, %c3_142, %c0_143], %158 {strides = array<i32>} : memref<2x8x128xf32, #tpu.memory_space<vmem>>, vector<1x1x128xf32>,
    %cst_144 = arith.constant 0.000000e+00 : f32
    %159 = vector.broadcast %cst_144 : f32 to vector<8x128xf32>
    %c0_145 = arith.constant 0 : index
    %c0_146 = arith.constant 0 : index
    %c0_147 = arith.constant 0 : index
    %160 = vector.load %arg2[%c0_145, %c0_146, %c0_147] : memref<2x40x128xf32, #tpu.memory_space<vmem>>, vector<1x8x128xf32>
    %161 = vector.shape_cast %160 : vector<1x8x128xf32> to vector<8x128xf32>
    %c4 = arith.constant 4 : index
    %c0_148 = arith.constant 0 : index
    %c0_149 = arith.constant 0 : index
    %162 = vector.load %arg3[%c4, %c0_148, %c0_149] : memref<8x40x128xf32, #tpu.memory_space<vmem>>, vector<1x8x128xf32>
    %163 = vector.shape_cast %162 : vector<1x8x128xf32> to vector<8x128xf32>
    %164 = arith.mulf %161, %163 : vector<8x128xf32>
    %165 = arith.addf %159, %164 : vector<8x128xf32>
    %c0_150 = arith.constant 0 : index
    %c8_151 = arith.constant 8 : index
    %c0_152 = arith.constant 0 : index
    %166 = vector.load %arg2[%c0_150, %c8_151, %c0_152] : memref<2x40x128xf32, #tpu.memory_space<vmem>>, vector<1x8x128xf32>
    %167 = vector.shape_cast %166 : vector<1x8x128xf32> to vector<8x128xf32>
    %c4_153 = arith.constant 4 : index
    %c8_154 = arith.constant 8 : index
    %c0_155 = arith.constant 0 : index
    %168 = vector.load %arg3[%c4_153, %c8_154, %c0_155] : memref<8x40x128xf32, #tpu.memory_space<vmem>>, vector<1x8x128xf32>
    %169 = vector.shape_cast %168 : vector<1x8x128xf32> to vector<8x128xf32>
    %170 = arith.mulf %167, %169 : vector<8x128xf32>
    %171 = arith.addf %165, %170 : vector<8x128xf32>
    %c0_156 = arith.constant 0 : index
    %c16_157 = arith.constant 16 : index
    %c0_158 = arith.constant 0 : index
    %172 = vector.load %arg2[%c0_156, %c16_157, %c0_158] : memref<2x40x128xf32, #tpu.memory_space<vmem>>, vector<1x8x128xf32>
    %173 = vector.shape_cast %172 : vector<1x8x128xf32> to vector<8x128xf32>
    %c4_159 = arith.constant 4 : index
    %c16_160 = arith.constant 16 : index
    %c0_161 = arith.constant 0 : index
    %174 = vector.load %arg3[%c4_159, %c16_160, %c0_161] : memref<8x40x128xf32, #tpu.memory_space<vmem>>, vector<1x8x128xf32>
    %175 = vector.shape_cast %174 : vector<1x8x128xf32> to vector<8x128xf32>
    %176 = arith.mulf %173, %175 : vector<8x128xf32>
    %177 = arith.addf %171, %176 : vector<8x128xf32>
    %c0_162 = arith.constant 0 : index
    %c24_163 = arith.constant 24 : index
    %c0_164 = arith.constant 0 : index
    %178 = vector.load %arg2[%c0_162, %c24_163, %c0_164] : memref<2x40x128xf32, #tpu.memory_space<vmem>>, vector<1x8x128xf32>
    %179 = vector.shape_cast %178 : vector<1x8x128xf32> to vector<8x128xf32>
    %c4_165 = arith.constant 4 : index
    %c24_166 = arith.constant 24 : index
    %c0_167 = arith.constant 0 : index
    %180 = vector.load %arg3[%c4_165, %c24_166, %c0_167] : memref<8x40x128xf32, #tpu.memory_space<vmem>>, vector<1x8x128xf32>
    %181 = vector.shape_cast %180 : vector<1x8x128xf32> to vector<8x128xf32>
    %182 = arith.mulf %179, %181 : vector<8x128xf32>
    %183 = arith.addf %177, %182 : vector<8x128xf32>
    %c0_168 = arith.constant 0 : index
    %c32_169 = arith.constant 32 : index
    %c0_170 = arith.constant 0 : index
    %184 = vector.load %arg2[%c0_168, %c32_169, %c0_170] : memref<2x40x128xf32, #tpu.memory_space<vmem>>, vector<1x8x128xf32>
    %185 = vector.shape_cast %184 : vector<1x8x128xf32> to vector<8x128xf32>
    %c4_171 = arith.constant 4 : index
    %c32_172 = arith.constant 32 : index
    %c0_173 = arith.constant 0 : index
    %186 = vector.load %arg3[%c4_171, %c32_172, %c0_173] : memref<8x40x128xf32, #tpu.memory_space<vmem>>, vector<1x8x128xf32>
    %187 = vector.shape_cast %186 : vector<1x8x128xf32> to vector<8x128xf32>
    %188 = arith.mulf %185, %187 : vector<8x128xf32>
    %189 = arith.addf %183, %188 : vector<8x128xf32>
    %c0_174 = arith.constant 0 : index
    %c4_175 = arith.constant 4 : index
    %c0_176 = arith.constant 0 : index
    %190 = vector.load %arg6[%c0_174, %c4_175, %c0_176] : memref<2x8x128xf32, #tpu.memory_space<vmem>>, vector<1x1x128xf32>
    %191 = vector.shape_cast %190 : vector<1x1x128xf32> to vector<1x128xf32>
    %cst_177 = arith.constant dense<0.000000e+00> : vector<128xf32>
    %192 = vector.multi_reduction <add>, %189, %cst_177 [0] : vector<8x128xf32> to vector<128xf32>
    %193 = vector.shape_cast %192 : vector<128xf32> to vector<1x128xf32>
    %194 = arith.addf %191, %193 : vector<1x128xf32>
    %c0_178 = arith.constant 0 : index
    %c4_179 = arith.constant 4 : index
    %c0_180 = arith.constant 0 : index
    %195 = vector.load %arg6[%c0_178, %c4_179, %c0_180] : memref<2x8x128xf32, #tpu.memory_space<vmem>>, vector<1x1x128xf32>
    %196 = vector.shape_cast %195 : vector<1x1x128xf32> to vector<1x128xf32>
    %197 = vector.shape_cast %194 : vector<1x128xf32> to vector<1x1x128xf32>
    tpu.vector_store %arg6[%c0_178, %c4_179, %c0_180], %197 {strides = array<i32>} : memref<2x8x128xf32, #tpu.memory_space<vmem>>, vector<1x1x128xf32>,
    %cst_181 = arith.constant 0.000000e+00 : f32
    %198 = vector.broadcast %cst_181 : f32 to vector<8x128xf32>
    %c0_182 = arith.constant 0 : index
    %c0_183 = arith.constant 0 : index
    %c0_184 = arith.constant 0 : index
    %199 = vector.load %arg2[%c0_182, %c0_183, %c0_184] : memref<2x40x128xf32, #tpu.memory_space<vmem>>, vector<1x8x128xf32>
    %200 = vector.shape_cast %199 : vector<1x8x128xf32> to vector<8x128xf32>
    %c5 = arith.constant 5 : index
    %c0_185 = arith.constant 0 : index
    %c0_186 = arith.constant 0 : index
    %201 = vector.load %arg3[%c5, %c0_185, %c0_186] : memref<8x40x128xf32, #tpu.memory_space<vmem>>, vector<1x8x128xf32>
    %202 = vector.shape_cast %201 : vector<1x8x128xf32> to vector<8x128xf32>
    %203 = arith.mulf %200, %202 : vector<8x128xf32>
    %204 = arith.addf %198, %203 : vector<8x128xf32>
    %c0_187 = arith.constant 0 : index
    %c8_188 = arith.constant 8 : index
    %c0_189 = arith.constant 0 : index
    %205 = vector.load %arg2[%c0_187, %c8_188, %c0_189] : memref<2x40x128xf32, #tpu.memory_space<vmem>>, vector<1x8x128xf32>
    %206 = vector.shape_cast %205 : vector<1x8x128xf32> to vector<8x128xf32>
    %c5_190 = arith.constant 5 : index
    %c8_191 = arith.constant 8 : index
    %c0_192 = arith.constant 0 : index
    %207 = vector.load %arg3[%c5_190, %c8_191, %c0_192] : memref<8x40x128xf32, #tpu.memory_space<vmem>>, vector<1x8x128xf32>
    %208 = vector.shape_cast %207 : vector<1x8x128xf32> to vector<8x128xf32>
    %209 = arith.mulf %206, %208 : vector<8x128xf32>
    %210 = arith.addf %204, %209 : vector<8x128xf32>
    %c0_193 = arith.constant 0 : index
    %c16_194 = arith.constant 16 : index
    %c0_195 = arith.constant 0 : index
    %211 = vector.load %arg2[%c0_193, %c16_194, %c0_195] : memref<2x40x128xf32, #tpu.memory_space<vmem>>, vector<1x8x128xf32>
    %212 = vector.shape_cast %211 : vector<1x8x128xf32> to vector<8x128xf32>
    %c5_196 = arith.constant 5 : index
    %c16_197 = arith.constant 16 : index
    %c0_198 = arith.constant 0 : index
    %213 = vector.load %arg3[%c5_196, %c16_197, %c0_198] : memref<8x40x128xf32, #tpu.memory_space<vmem>>, vector<1x8x128xf32>
    %214 = vector.shape_cast %213 : vector<1x8x128xf32> to vector<8x128xf32>
    %215 = arith.mulf %212, %214 : vector<8x128xf32>
    %216 = arith.addf %210, %215 : vector<8x128xf32>
    %c0_199 = arith.constant 0 : index
    %c24_200 = arith.constant 24 : index
    %c0_201 = arith.constant 0 : index
    %217 = vector.load %arg2[%c0_199, %c24_200, %c0_201] : memref<2x40x128xf32, #tpu.memory_space<vmem>>, vector<1x8x128xf32>
    %218 = vector.shape_cast %217 : vector<1x8x128xf32> to vector<8x128xf32>
    %c5_202 = arith.constant 5 : index
    %c24_203 = arith.constant 24 : index
    %c0_204 = arith.constant 0 : index
    %219 = vector.load %arg3[%c5_202, %c24_203, %c0_204] : memref<8x40x128xf32, #tpu.memory_space<vmem>>, vector<1x8x128xf32>
    %220 = vector.shape_cast %219 : vector<1x8x128xf32> to vector<8x128xf32>
    %221 = arith.mulf %218, %220 : vector<8x128xf32>
    %222 = arith.addf %216, %221 : vector<8x128xf32>
    %c0_205 = arith.constant 0 : index
    %c32_206 = arith.constant 32 : index
    %c0_207 = arith.constant 0 : index
    %223 = vector.load %arg2[%c0_205, %c32_206, %c0_207] : memref<2x40x128xf32, #tpu.memory_space<vmem>>, vector<1x8x128xf32>
    %224 = vector.shape_cast %223 : vector<1x8x128xf32> to vector<8x128xf32>
    %c5_208 = arith.constant 5 : index
    %c32_209 = arith.constant 32 : index
    %c0_210 = arith.constant 0 : index
    %225 = vector.load %arg3[%c5_208, %c32_209, %c0_210] : memref<8x40x128xf32, #tpu.memory_space<vmem>>, vector<1x8x128xf32>
    %226 = vector.shape_cast %225 : vector<1x8x128xf32> to vector<8x128xf32>
    %227 = arith.mulf %224, %226 : vector<8x128xf32>
    %228 = arith.addf %222, %227 : vector<8x128xf32>
    %c0_211 = arith.constant 0 : index
    %c5_212 = arith.constant 5 : index
    %c0_213 = arith.constant 0 : index
    %229 = vector.load %arg6[%c0_211, %c5_212, %c0_213] : memref<2x8x128xf32, #tpu.memory_space<vmem>>, vector<1x1x128xf32>
    %230 = vector.shape_cast %229 : vector<1x1x128xf32> to vector<1x128xf32>
    %cst_214 = arith.constant dense<0.000000e+00> : vector<128xf32>
    %231 = vector.multi_reduction <add>, %228, %cst_214 [0] : vector<8x128xf32> to vector<128xf32>
    %232 = vector.shape_cast %231 : vector<128xf32> to vector<1x128xf32>
    %233 = arith.addf %230, %232 : vector<1x128xf32>
    %c0_215 = arith.constant 0 : index
    %c5_216 = arith.constant 5 : index
    %c0_217 = arith.constant 0 : index
    %234 = vector.load %arg6[%c0_215, %c5_216, %c0_217] : memref<2x8x128xf32, #tpu.memory_space<vmem>>, vector<1x1x128xf32>
    %235 = vector.shape_cast %234 : vector<1x1x128xf32> to vector<1x128xf32>
    %236 = vector.shape_cast %233 : vector<1x128xf32> to vector<1x1x128xf32>
    tpu.vector_store %arg6[%c0_215, %c5_216, %c0_217], %236 {strides = array<i32>} : memref<2x8x128xf32, #tpu.memory_space<vmem>>, vector<1x1x128xf32>,
    %cst_218 = arith.constant 0.000000e+00 : f32
    %237 = vector.broadcast %cst_218 : f32 to vector<8x128xf32>
    %c0_219 = arith.constant 0 : index
    %c0_220 = arith.constant 0 : index
    %c0_221 = arith.constant 0 : index
    %238 = vector.load %arg2[%c0_219, %c0_220, %c0_221] : memref<2x40x128xf32, #tpu.memory_space<vmem>>, vector<1x8x128xf32>
    %239 = vector.shape_cast %238 : vector<1x8x128xf32> to vector<8x128xf32>
    %c6 = arith.constant 6 : index
    %c0_222 = arith.constant 0 : index
    %c0_223 = arith.constant 0 : index
    %240 = vector.load %arg3[%c6, %c0_222, %c0_223] : memref<8x40x128xf32, #tpu.memory_space<vmem>>, vector<1x8x128xf32>
    %241 = vector.shape_cast %240 : vector<1x8x128xf32> to vector<8x128xf32>
    %242 = arith.mulf %239, %241 : vector<8x128xf32>
    %243 = arith.addf %237, %242 : vector<8x128xf32>
    %c0_224 = arith.constant 0 : index
    %c8_225 = arith.constant 8 : index
    %c0_226 = arith.constant 0 : index
    %244 = vector.load %arg2[%c0_224, %c8_225, %c0_226] : memref<2x40x128xf32, #tpu.memory_space<vmem>>, vector<1x8x128xf32>
    %245 = vector.shape_cast %244 : vector<1x8x128xf32> to vector<8x128xf32>
    %c6_227 = arith.constant 6 : index
    %c8_228 = arith.constant 8 : index
    %c0_229 = arith.constant 0 : index
    %246 = vector.load %arg3[%c6_227, %c8_228, %c0_229] : memref<8x40x128xf32, #tpu.memory_space<vmem>>, vector<1x8x128xf32>
    %247 = vector.shape_cast %246 : vector<1x8x128xf32> to vector<8x128xf32>
    %248 = arith.mulf %245, %247 : vector<8x128xf32>
    %249 = arith.addf %243, %248 : vector<8x128xf32>
    %c0_230 = arith.constant 0 : index
    %c16_231 = arith.constant 16 : index
    %c0_232 = arith.constant 0 : index
    %250 = vector.load %arg2[%c0_230, %c16_231, %c0_232] : memref<2x40x128xf32, #tpu.memory_space<vmem>>, vector<1x8x128xf32>
    %251 = vector.shape_cast %250 : vector<1x8x128xf32> to vector<8x128xf32>
    %c6_233 = arith.constant 6 : index
    %c16_234 = arith.constant 16 : index
    %c0_235 = arith.constant 0 : index
    %252 = vector.load %arg3[%c6_233, %c16_234, %c0_235] : memref<8x40x128xf32, #tpu.memory_space<vmem>>, vector<1x8x128xf32>
    %253 = vector.shape_cast %252 : vector<1x8x128xf32> to vector<8x128xf32>
    %254 = arith.mulf %251, %253 : vector<8x128xf32>
    %255 = arith.addf %249, %254 : vector<8x128xf32>
    %c0_236 = arith.constant 0 : index
    %c24_237 = arith.constant 24 : index
    %c0_238 = arith.constant 0 : index
    %256 = vector.load %arg2[%c0_236, %c24_237, %c0_238] : memref<2x40x128xf32, #tpu.memory_space<vmem>>, vector<1x8x128xf32>
    %257 = vector.shape_cast %256 : vector<1x8x128xf32> to vector<8x128xf32>
    %c6_239 = arith.constant 6 : index
    %c24_240 = arith.constant 24 : index
    %c0_241 = arith.constant 0 : index
    %258 = vector.load %arg3[%c6_239, %c24_240, %c0_241] : memref<8x40x128xf32, #tpu.memory_space<vmem>>, vector<1x8x128xf32>
    %259 = vector.shape_cast %258 : vector<1x8x128xf32> to vector<8x128xf32>
    %260 = arith.mulf %257, %259 : vector<8x128xf32>
    %261 = arith.addf %255, %260 : vector<8x128xf32>
    %c0_242 = arith.constant 0 : index
    %c32_243 = arith.constant 32 : index
    %c0_244 = arith.constant 0 : index
    %262 = vector.load %arg2[%c0_242, %c32_243, %c0_244] : memref<2x40x128xf32, #tpu.memory_space<vmem>>, vector<1x8x128xf32>
    %263 = vector.shape_cast %262 : vector<1x8x128xf32> to vector<8x128xf32>
    %c6_245 = arith.constant 6 : index
    %c32_246 = arith.constant 32 : index
    %c0_247 = arith.constant 0 : index
    %264 = vector.load %arg3[%c6_245, %c32_246, %c0_247] : memref<8x40x128xf32, #tpu.memory_space<vmem>>, vector<1x8x128xf32>
    %265 = vector.shape_cast %264 : vector<1x8x128xf32> to vector<8x128xf32>
    %266 = arith.mulf %263, %265 : vector<8x128xf32>
    %267 = arith.addf %261, %266 : vector<8x128xf32>
    %c0_248 = arith.constant 0 : index
    %c6_249 = arith.constant 6 : index
    %c0_250 = arith.constant 0 : index
    %268 = vector.load %arg6[%c0_248, %c6_249, %c0_250] : memref<2x8x128xf32, #tpu.memory_space<vmem>>, vector<1x1x128xf32>
    %269 = vector.shape_cast %268 : vector<1x1x128xf32> to vector<1x128xf32>
    %cst_251 = arith.constant dense<0.000000e+00> : vector<128xf32>
    %270 = vector.multi_reduction <add>, %267, %cst_251 [0] : vector<8x128xf32> to vector<128xf32>
    %271 = vector.shape_cast %270 : vector<128xf32> to vector<1x128xf32>
    %272 = arith.addf %269, %271 : vector<1x128xf32>
    %c0_252 = arith.constant 0 : index
    %c6_253 = arith.constant 6 : index
    %c0_254 = arith.constant 0 : index
    %273 = vector.load %arg6[%c0_252, %c6_253, %c0_254] : memref<2x8x128xf32, #tpu.memory_space<vmem>>, vector<1x1x128xf32>
    %274 = vector.shape_cast %273 : vector<1x1x128xf32> to vector<1x128xf32>
    %275 = vector.shape_cast %272 : vector<1x128xf32> to vector<1x1x128xf32>
    tpu.vector_store %arg6[%c0_252, %c6_253, %c0_254], %275 {strides = array<i32>} : memref<2x8x128xf32, #tpu.memory_space<vmem>>, vector<1x1x128xf32>,
    %cst_255 = arith.constant 0.000000e+00 : f32
    %276 = vector.broadcast %cst_255 : f32 to vector<8x128xf32>
    %c0_256 = arith.constant 0 : index
    %c0_257 = arith.constant 0 : index
    %c0_258 = arith.constant 0 : index
    %277 = vector.load %arg2[%c0_256, %c0_257, %c0_258] : memref<2x40x128xf32, #tpu.memory_space<vmem>>, vector<1x8x128xf32>
    %278 = vector.shape_cast %277 : vector<1x8x128xf32> to vector<8x128xf32>
    %c7 = arith.constant 7 : index
    %c0_259 = arith.constant 0 : index
    %c0_260 = arith.constant 0 : index
    %279 = vector.load %arg3[%c7, %c0_259, %c0_260] : memref<8x40x128xf32, #tpu.memory_space<vmem>>, vector<1x8x128xf32>
    %280 = vector.shape_cast %279 : vector<1x8x128xf32> to vector<8x128xf32>
    %281 = arith.mulf %278, %280 : vector<8x128xf32>
    %282 = arith.addf %276, %281 : vector<8x128xf32>
    %c0_261 = arith.constant 0 : index
    %c8_262 = arith.constant 8 : index
    %c0_263 = arith.constant 0 : index
    %283 = vector.load %arg2[%c0_261, %c8_262, %c0_263] : memref<2x40x128xf32, #tpu.memory_space<vmem>>, vector<1x8x128xf32>
    %284 = vector.shape_cast %283 : vector<1x8x128xf32> to vector<8x128xf32>
    %c7_264 = arith.constant 7 : index
    %c8_265 = arith.constant 8 : index
    %c0_266 = arith.constant 0 : index
    %285 = vector.load %arg3[%c7_264, %c8_265, %c0_266] : memref<8x40x128xf32, #tpu.memory_space<vmem>>, vector<1x8x128xf32>
    %286 = vector.shape_cast %285 : vector<1x8x128xf32> to vector<8x128xf32>
    %287 = arith.mulf %284, %286 : vector<8x128xf32>
    %288 = arith.addf %282, %287 : vector<8x128xf32>
    %c0_267 = arith.constant 0 : index
    %c16_268 = arith.constant 16 : index
    %c0_269 = arith.constant 0 : index
    %289 = vector.load %arg2[%c0_267, %c16_268, %c0_269] : memref<2x40x128xf32, #tpu.memory_space<vmem>>, vector<1x8x128xf32>
    %290 = vector.shape_cast %289 : vector<1x8x128xf32> to vector<8x128xf32>
    %c7_270 = arith.constant 7 : index
    %c16_271 = arith.constant 16 : index
    %c0_272 = arith.constant 0 : index
    %291 = vector.load %arg3[%c7_270, %c16_271, %c0_272] : memref<8x40x128xf32, #tpu.memory_space<vmem>>, vector<1x8x128xf32>
    %292 = vector.shape_cast %291 : vector<1x8x128xf32> to vector<8x128xf32>
    %293 = arith.mulf %290, %292 : vector<8x128xf32>
    %294 = arith.addf %288, %293 : vector<8x128xf32>
    %c0_273 = arith.constant 0 : index
    %c24_274 = arith.constant 24 : index
    %c0_275 = arith.constant 0 : index
    %295 = vector.load %arg2[%c0_273, %c24_274, %c0_275] : memref<2x40x128xf32, #tpu.memory_space<vmem>>, vector<1x8x128xf32>
    %296 = vector.shape_cast %295 : vector<1x8x128xf32> to vector<8x128xf32>
    %c7_276 = arith.constant 7 : index
    %c24_277 = arith.constant 24 : index
    %c0_278 = arith.constant 0 : index
    %297 = vector.load %arg3[%c7_276, %c24_277, %c0_278] : memref<8x40x128xf32, #tpu.memory_space<vmem>>, vector<1x8x128xf32>
    %298 = vector.shape_cast %297 : vector<1x8x128xf32> to vector<8x128xf32>
    %299 = arith.mulf %296, %298 : vector<8x128xf32>
    %300 = arith.addf %294, %299 : vector<8x128xf32>
    %c0_279 = arith.constant 0 : index
    %c32_280 = arith.constant 32 : index
    %c0_281 = arith.constant 0 : index
    %301 = vector.load %arg2[%c0_279, %c32_280, %c0_281] : memref<2x40x128xf32, #tpu.memory_space<vmem>>, vector<1x8x128xf32>
    %302 = vector.shape_cast %301 : vector<1x8x128xf32> to vector<8x128xf32>
    %c7_282 = arith.constant 7 : index
    %c32_283 = arith.constant 32 : index
    %c0_284 = arith.constant 0 : index
    %303 = vector.load %arg3[%c7_282, %c32_283, %c0_284] : memref<8x40x128xf32, #tpu.memory_space<vmem>>, vector<1x8x128xf32>
    %304 = vector.shape_cast %303 : vector<1x8x128xf32> to vector<8x128xf32>
    %305 = arith.mulf %302, %304 : vector<8x128xf32>
    %306 = arith.addf %300, %305 : vector<8x128xf32>
    %c0_285 = arith.constant 0 : index
    %c7_286 = arith.constant 7 : index
    %c0_287 = arith.constant 0 : index
    %307 = vector.load %arg6[%c0_285, %c7_286, %c0_287] : memref<2x8x128xf32, #tpu.memory_space<vmem>>, vector<1x1x128xf32>
    %308 = vector.shape_cast %307 : vector<1x1x128xf32> to vector<1x128xf32>
    %cst_288 = arith.constant dense<0.000000e+00> : vector<128xf32>
    %309 = vector.multi_reduction <add>, %306, %cst_288 [0] : vector<8x128xf32> to vector<128xf32>
    %310 = vector.shape_cast %309 : vector<128xf32> to vector<1x128xf32>
    %311 = arith.addf %308, %310 : vector<1x128xf32>
    %c0_289 = arith.constant 0 : index
    %c7_290 = arith.constant 7 : index
    %c0_291 = arith.constant 0 : index
    %312 = vector.load %arg6[%c0_289, %c7_290, %c0_291] : memref<2x8x128xf32, #tpu.memory_space<vmem>>, vector<1x1x128xf32>
    %313 = vector.shape_cast %312 : vector<1x1x128xf32> to vector<1x128xf32>
    %314 = vector.shape_cast %311 : vector<1x128xf32> to vector<1x1x128xf32>
    tpu.vector_store %arg6[%c0_289, %c7_290, %c0_291], %314 {strides = array<i32>} : memref<2x8x128xf32, #tpu.memory_space<vmem>>, vector<1x1x128xf32>,
    %cst_292 = arith.constant 0.000000e+00 : f32
    %315 = vector.broadcast %cst_292 : f32 to vector<8x128xf32>
    %c1_293 = arith.constant 1 : index
    %c0_294 = arith.constant 0 : index
    %c0_295 = arith.constant 0 : index
    %316 = vector.load %arg2[%c1_293, %c0_294, %c0_295] : memref<2x40x128xf32, #tpu.memory_space<vmem>>, vector<1x8x128xf32>
    %317 = vector.shape_cast %316 : vector<1x8x128xf32> to vector<8x128xf32>
    %c0_296 = arith.constant 0 : index
    %c0_297 = arith.constant 0 : index
    %c0_298 = arith.constant 0 : index
    %318 = vector.load %arg3[%c0_296, %c0_297, %c0_298] : memref<8x40x128xf32, #tpu.memory_space<vmem>>, vector<1x8x128xf32>
    %319 = vector.shape_cast %318 : vector<1x8x128xf32> to vector<8x128xf32>
    %320 = arith.mulf %317, %319 : vector<8x128xf32>
    %321 = arith.addf %315, %320 : vector<8x128xf32>
    %c1_299 = arith.constant 1 : index
    %c8_300 = arith.constant 8 : index
    %c0_301 = arith.constant 0 : index
    %322 = vector.load %arg2[%c1_299, %c8_300, %c0_301] : memref<2x40x128xf32, #tpu.memory_space<vmem>>, vector<1x8x128xf32>
    %323 = vector.shape_cast %322 : vector<1x8x128xf32> to vector<8x128xf32>
    %c0_302 = arith.constant 0 : index
    %c8_303 = arith.constant 8 : index
    %c0_304 = arith.constant 0 : index
    %324 = vector.load %arg3[%c0_302, %c8_303, %c0_304] : memref<8x40x128xf32, #tpu.memory_space<vmem>>, vector<1x8x128xf32>
    %325 = vector.shape_cast %324 : vector<1x8x128xf32> to vector<8x128xf32>
    %326 = arith.mulf %323, %325 : vector<8x128xf32>
    %327 = arith.addf %321, %326 : vector<8x128xf32>
    %c1_305 = arith.constant 1 : index
    %c16_306 = arith.constant 16 : index
    %c0_307 = arith.constant 0 : index
    %328 = vector.load %arg2[%c1_305, %c16_306, %c0_307] : memref<2x40x128xf32, #tpu.memory_space<vmem>>, vector<1x8x128xf32>
    %329 = vector.shape_cast %328 : vector<1x8x128xf32> to vector<8x128xf32>
    %c0_308 = arith.constant 0 : index
    %c16_309 = arith.constant 16 : index
    %c0_310 = arith.constant 0 : index
    %330 = vector.load %arg3[%c0_308, %c16_309, %c0_310] : memref<8x40x128xf32, #tpu.memory_space<vmem>>, vector<1x8x128xf32>
    %331 = vector.shape_cast %330 : vector<1x8x128xf32> to vector<8x128xf32>
    %332 = arith.mulf %329, %331 : vector<8x128xf32>
    %333 = arith.addf %327, %332 : vector<8x128xf32>
    %c1_311 = arith.constant 1 : index
    %c24_312 = arith.constant 24 : index
    %c0_313 = arith.constant 0 : index
    %334 = vector.load %arg2[%c1_311, %c24_312, %c0_313] : memref<2x40x128xf32, #tpu.memory_space<vmem>>, vector<1x8x128xf32>
    %335 = vector.shape_cast %334 : vector<1x8x128xf32> to vector<8x128xf32>
    %c0_314 = arith.constant 0 : index
    %c24_315 = arith.constant 24 : index
    %c0_316 = arith.constant 0 : index
    %336 = vector.load %arg3[%c0_314, %c24_315, %c0_316] : memref<8x40x128xf32, #tpu.memory_space<vmem>>, vector<1x8x128xf32>
    %337 = vector.shape_cast %336 : vector<1x8x128xf32> to vector<8x128xf32>
    %338 = arith.mulf %335, %337 : vector<8x128xf32>
    %339 = arith.addf %333, %338 : vector<8x128xf32>
    %c1_317 = arith.constant 1 : index
    %c32_318 = arith.constant 32 : index
    %c0_319 = arith.constant 0 : index
    %340 = vector.load %arg2[%c1_317, %c32_318, %c0_319] : memref<2x40x128xf32, #tpu.memory_space<vmem>>, vector<1x8x128xf32>
    %341 = vector.shape_cast %340 : vector<1x8x128xf32> to vector<8x128xf32>
    %c0_320 = arith.constant 0 : index
    %c32_321 = arith.constant 32 : index
    %c0_322 = arith.constant 0 : index
    %342 = vector.load %arg3[%c0_320, %c32_321, %c0_322] : memref<8x40x128xf32, #tpu.memory_space<vmem>>, vector<1x8x128xf32>
    %343 = vector.shape_cast %342 : vector<1x8x128xf32> to vector<8x128xf32>
    %344 = arith.mulf %341, %343 : vector<8x128xf32>
    %345 = arith.addf %339, %344 : vector<8x128xf32>
    %c1_323 = arith.constant 1 : index
    %c0_324 = arith.constant 0 : index
    %c0_325 = arith.constant 0 : index
    %346 = vector.load %arg6[%c1_323, %c0_324, %c0_325] : memref<2x8x128xf32, #tpu.memory_space<vmem>>, vector<1x1x128xf32>
    %347 = vector.shape_cast %346 : vector<1x1x128xf32> to vector<1x128xf32>
    %cst_326 = arith.constant dense<0.000000e+00> : vector<128xf32>
    %348 = vector.multi_reduction <add>, %345, %cst_326 [0] : vector<8x128xf32> to vector<128xf32>
    %349 = vector.shape_cast %348 : vector<128xf32> to vector<1x128xf32>
    %350 = arith.addf %347, %349 : vector<1x128xf32>
    %c1_327 = arith.constant 1 : index
    %c0_328 = arith.constant 0 : index
    %c0_329 = arith.constant 0 : index
    %351 = vector.load %arg6[%c1_327, %c0_328, %c0_329] : memref<2x8x128xf32, #tpu.memory_space<vmem>>, vector<1x1x128xf32>
    %352 = vector.shape_cast %351 : vector<1x1x128xf32> to vector<1x128xf32>
    %353 = vector.shape_cast %350 : vector<1x128xf32> to vector<1x1x128xf32>
    tpu.vector_store %arg6[%c1_327, %c0_328, %c0_329], %353 {strides = array<i32>} : memref<2x8x128xf32, #tpu.memory_space<vmem>>, vector<1x1x128xf32>,
    %cst_330 = arith.constant 0.000000e+00 : f32
    %354 = vector.broadcast %cst_330 : f32 to vector<8x128xf32>
    %c1_331 = arith.constant 1 : index
    %c0_332 = arith.constant 0 : index
    %c0_333 = arith.constant 0 : index
    %355 = vector.load %arg2[%c1_331, %c0_332, %c0_333] : memref<2x40x128xf32, #tpu.memory_space<vmem>>, vector<1x8x128xf32>
    %356 = vector.shape_cast %355 : vector<1x8x128xf32> to vector<8x128xf32>
    %c1_334 = arith.constant 1 : index
    %c0_335 = arith.constant 0 : index
    %c0_336 = arith.constant 0 : index
    %357 = vector.load %arg3[%c1_334, %c0_335, %c0_336] : memref<8x40x128xf32, #tpu.memory_space<vmem>>, vector<1x8x128xf32>
    %358 = vector.shape_cast %357 : vector<1x8x128xf32> to vector<8x128xf32>
    %359 = arith.mulf %356, %358 : vector<8x128xf32>
    %360 = arith.addf %354, %359 : vector<8x128xf32>
    %c1_337 = arith.constant 1 : index
    %c8_338 = arith.constant 8 : index
    %c0_339 = arith.constant 0 : index
    %361 = vector.load %arg2[%c1_337, %c8_338, %c0_339] : memref<2x40x128xf32, #tpu.memory_space<vmem>>, vector<1x8x128xf32>
    %362 = vector.shape_cast %361 : vector<1x8x128xf32> to vector<8x128xf32>
    %c1_340 = arith.constant 1 : index
    %c8_341 = arith.constant 8 : index
    %c0_342 = arith.constant 0 : index
    %363 = vector.load %arg3[%c1_340, %c8_341, %c0_342] : memref<8x40x128xf32, #tpu.memory_space<vmem>>, vector<1x8x128xf32>
    %364 = vector.shape_cast %363 : vector<1x8x128xf32> to vector<8x128xf32>
    %365 = arith.mulf %362, %364 : vector<8x128xf32>
    %366 = arith.addf %360, %365 : vector<8x128xf32>
    %c1_343 = arith.constant 1 : index
    %c16_344 = arith.constant 16 : index
    %c0_345 = arith.constant 0 : index
    %367 = vector.load %arg2[%c1_343, %c16_344, %c0_345] : memref<2x40x128xf32, #tpu.memory_space<vmem>>, vector<1x8x128xf32>
    %368 = vector.shape_cast %367 : vector<1x8x128xf32> to vector<8x128xf32>
    %c1_346 = arith.constant 1 : index
    %c16_347 = arith.constant 16 : index
    %c0_348 = arith.constant 0 : index
    %369 = vector.load %arg3[%c1_346, %c16_347, %c0_348] : memref<8x40x128xf32, #tpu.memory_space<vmem>>, vector<1x8x128xf32>
    %370 = vector.shape_cast %369 : vector<1x8x128xf32> to vector<8x128xf32>
    %371 = arith.mulf %368, %370 : vector<8x128xf32>
    %372 = arith.addf %366, %371 : vector<8x128xf32>
    %c1_349 = arith.constant 1 : index
    %c24_350 = arith.constant 24 : index
    %c0_351 = arith.constant 0 : index
    %373 = vector.load %arg2[%c1_349, %c24_350, %c0_351] : memref<2x40x128xf32, #tpu.memory_space<vmem>>, vector<1x8x128xf32>
    %374 = vector.shape_cast %373 : vector<1x8x128xf32> to vector<8x128xf32>
    %c1_352 = arith.constant 1 : index
    %c24_353 = arith.constant 24 : index
    %c0_354 = arith.constant 0 : index
    %375 = vector.load %arg3[%c1_352, %c24_353, %c0_354] : memref<8x40x128xf32, #tpu.memory_space<vmem>>, vector<1x8x128xf32>
    %376 = vector.shape_cast %375 : vector<1x8x128xf32> to vector<8x128xf32>
    %377 = arith.mulf %374, %376 : vector<8x128xf32>
    %378 = arith.addf %372, %377 : vector<8x128xf32>
    %c1_355 = arith.constant 1 : index
    %c32_356 = arith.constant 32 : index
    %c0_357 = arith.constant 0 : index
    %379 = vector.load %arg2[%c1_355, %c32_356, %c0_357] : memref<2x40x128xf32, #tpu.memory_space<vmem>>, vector<1x8x128xf32>
    %380 = vector.shape_cast %379 : vector<1x8x128xf32> to vector<8x128xf32>
    %c1_358 = arith.constant 1 : index
    %c32_359 = arith.constant 32 : index
    %c0_360 = arith.constant 0 : index
    %381 = vector.load %arg3[%c1_358, %c32_359, %c0_360] : memref<8x40x128xf32, #tpu.memory_space<vmem>>, vector<1x8x128xf32>
    %382 = vector.shape_cast %381 : vector<1x8x128xf32> to vector<8x128xf32>
    %383 = arith.mulf %380, %382 : vector<8x128xf32>
    %384 = arith.addf %378, %383 : vector<8x128xf32>
    %c1_361 = arith.constant 1 : index
    %c1_362 = arith.constant 1 : index
    %c0_363 = arith.constant 0 : index
    %385 = vector.load %arg6[%c1_361, %c1_362, %c0_363] : memref<2x8x128xf32, #tpu.memory_space<vmem>>, vector<1x1x128xf32>
    %386 = vector.shape_cast %385 : vector<1x1x128xf32> to vector<1x128xf32>
    %cst_364 = arith.constant dense<0.000000e+00> : vector<128xf32>
    %387 = vector.multi_reduction <add>, %384, %cst_364 [0] : vector<8x128xf32> to vector<128xf32>
    %388 = vector.shape_cast %387 : vector<128xf32> to vector<1x128xf32>
    %389 = arith.addf %386, %388 : vector<1x128xf32>
    %c1_365 = arith.constant 1 : index
    %c1_366 = arith.constant 1 : index
    %c0_367 = arith.constant 0 : index
    %390 = vector.load %arg6[%c1_365, %c1_366, %c0_367] : memref<2x8x128xf32, #tpu.memory_space<vmem>>, vector<1x1x128xf32>
    %391 = vector.shape_cast %390 : vector<1x1x128xf32> to vector<1x128xf32>
    %392 = vector.shape_cast %389 : vector<1x128xf32> to vector<1x1x128xf32>
    tpu.vector_store %arg6[%c1_365, %c1_366, %c0_367], %392 {strides = array<i32>} : memref<2x8x128xf32, #tpu.memory_space<vmem>>, vector<1x1x128xf32>,
    %cst_368 = arith.constant 0.000000e+00 : f32
    %393 = vector.broadcast %cst_368 : f32 to vector<8x128xf32>
    %c1_369 = arith.constant 1 : index
    %c0_370 = arith.constant 0 : index
    %c0_371 = arith.constant 0 : index
    %394 = vector.load %arg2[%c1_369, %c0_370, %c0_371] : memref<2x40x128xf32, #tpu.memory_space<vmem>>, vector<1x8x128xf32>
    %395 = vector.shape_cast %394 : vector<1x8x128xf32> to vector<8x128xf32>
    %c2_372 = arith.constant 2 : index
    %c0_373 = arith.constant 0 : index
    %c0_374 = arith.constant 0 : index
    %396 = vector.load %arg3[%c2_372, %c0_373, %c0_374] : memref<8x40x128xf32, #tpu.memory_space<vmem>>, vector<1x8x128xf32>
    %397 = vector.shape_cast %396 : vector<1x8x128xf32> to vector<8x128xf32>
    %398 = arith.mulf %395, %397 : vector<8x128xf32>
    %399 = arith.addf %393, %398 : vector<8x128xf32>
    %c1_375 = arith.constant 1 : index
    %c8_376 = arith.constant 8 : index
    %c0_377 = arith.constant 0 : index
    %400 = vector.load %arg2[%c1_375, %c8_376, %c0_377] : memref<2x40x128xf32, #tpu.memory_space<vmem>>, vector<1x8x128xf32>
    %401 = vector.shape_cast %400 : vector<1x8x128xf32> to vector<8x128xf32>
    %c2_378 = arith.constant 2 : index
    %c8_379 = arith.constant 8 : index
    %c0_380 = arith.constant 0 : index
    %402 = vector.load %arg3[%c2_378, %c8_379, %c0_380] : memref<8x40x128xf32, #tpu.memory_space<vmem>>, vector<1x8x128xf32>
    %403 = vector.shape_cast %402 : vector<1x8x128xf32> to vector<8x128xf32>
    %404 = arith.mulf %401, %403 : vector<8x128xf32>
    %405 = arith.addf %399, %404 : vector<8x128xf32>
    %c1_381 = arith.constant 1 : index
    %c16_382 = arith.constant 16 : index
    %c0_383 = arith.constant 0 : index
    %406 = vector.load %arg2[%c1_381, %c16_382, %c0_383] : memref<2x40x128xf32, #tpu.memory_space<vmem>>, vector<1x8x128xf32>
    %407 = vector.shape_cast %406 : vector<1x8x128xf32> to vector<8x128xf32>
    %c2_384 = arith.constant 2 : index
    %c16_385 = arith.constant 16 : index
    %c0_386 = arith.constant 0 : index
    %408 = vector.load %arg3[%c2_384, %c16_385, %c0_386] : memref<8x40x128xf32, #tpu.memory_space<vmem>>, vector<1x8x128xf32>
    %409 = vector.shape_cast %408 : vector<1x8x128xf32> to vector<8x128xf32>
    %410 = arith.mulf %407, %409 : vector<8x128xf32>
    %411 = arith.addf %405, %410 : vector<8x128xf32>
    %c1_387 = arith.constant 1 : index
    %c24_388 = arith.constant 24 : index
    %c0_389 = arith.constant 0 : index
    %412 = vector.load %arg2[%c1_387, %c24_388, %c0_389] : memref<2x40x128xf32, #tpu.memory_space<vmem>>, vector<1x8x128xf32>
    %413 = vector.shape_cast %412 : vector<1x8x128xf32> to vector<8x128xf32>
    %c2_390 = arith.constant 2 : index
    %c24_391 = arith.constant 24 : index
    %c0_392 = arith.constant 0 : index
    %414 = vector.load %arg3[%c2_390, %c24_391, %c0_392] : memref<8x40x128xf32, #tpu.memory_space<vmem>>, vector<1x8x128xf32>
    %415 = vector.shape_cast %414 : vector<1x8x128xf32> to vector<8x128xf32>
    %416 = arith.mulf %413, %415 : vector<8x128xf32>
    %417 = arith.addf %411, %416 : vector<8x128xf32>
    %c1_393 = arith.constant 1 : index
    %c32_394 = arith.constant 32 : index
    %c0_395 = arith.constant 0 : index
    %418 = vector.load %arg2[%c1_393, %c32_394, %c0_395] : memref<2x40x128xf32, #tpu.memory_space<vmem>>, vector<1x8x128xf32>
    %419 = vector.shape_cast %418 : vector<1x8x128xf32> to vector<8x128xf32>
    %c2_396 = arith.constant 2 : index
    %c32_397 = arith.constant 32 : index
    %c0_398 = arith.constant 0 : index
    %420 = vector.load %arg3[%c2_396, %c32_397, %c0_398] : memref<8x40x128xf32, #tpu.memory_space<vmem>>, vector<1x8x128xf32>
    %421 = vector.shape_cast %420 : vector<1x8x128xf32> to vector<8x128xf32>
    %422 = arith.mulf %419, %421 : vector<8x128xf32>
    %423 = arith.addf %417, %422 : vector<8x128xf32>
    %c1_399 = arith.constant 1 : index
    %c2_400 = arith.constant 2 : index
    %c0_401 = arith.constant 0 : index
    %424 = vector.load %arg6[%c1_399, %c2_400, %c0_401] : memref<2x8x128xf32, #tpu.memory_space<vmem>>, vector<1x1x128xf32>
    %425 = vector.shape_cast %424 : vector<1x1x128xf32> to vector<1x128xf32>
    %cst_402 = arith.constant dense<0.000000e+00> : vector<128xf32>
    %426 = vector.multi_reduction <add>, %423, %cst_402 [0] : vector<8x128xf32> to vector<128xf32>
    %427 = vector.shape_cast %426 : vector<128xf32> to vector<1x128xf32>
    %428 = arith.addf %425, %427 : vector<1x128xf32>
    %c1_403 = arith.constant 1 : index
    %c2_404 = arith.constant 2 : index
    %c0_405 = arith.constant 0 : index
    %429 = vector.load %arg6[%c1_403, %c2_404, %c0_405] : memref<2x8x128xf32, #tpu.memory_space<vmem>>, vector<1x1x128xf32>
    %430 = vector.shape_cast %429 : vector<1x1x128xf32> to vector<1x128xf32>
    %431 = vector.shape_cast %428 : vector<1x128xf32> to vector<1x1x128xf32>
    tpu.vector_store %arg6[%c1_403, %c2_404, %c0_405], %431 {strides = array<i32>} : memref<2x8x128xf32, #tpu.memory_space<vmem>>, vector<1x1x128xf32>,
    %cst_406 = arith.constant 0.000000e+00 : f32
    %432 = vector.broadcast %cst_406 : f32 to vector<8x128xf32>
    %c1_407 = arith.constant 1 : index
    %c0_408 = arith.constant 0 : index
    %c0_409 = arith.constant 0 : index
    %433 = vector.load %arg2[%c1_407, %c0_408, %c0_409] : memref<2x40x128xf32, #tpu.memory_space<vmem>>, vector<1x8x128xf32>
    %434 = vector.shape_cast %433 : vector<1x8x128xf32> to vector<8x128xf32>
    %c3_410 = arith.constant 3 : index
    %c0_411 = arith.constant 0 : index
    %c0_412 = arith.constant 0 : index
    %435 = vector.load %arg3[%c3_410, %c0_411, %c0_412] : memref<8x40x128xf32, #tpu.memory_space<vmem>>, vector<1x8x128xf32>
    %436 = vector.shape_cast %435 : vector<1x8x128xf32> to vector<8x128xf32>
    %437 = arith.mulf %434, %436 : vector<8x128xf32>
    %438 = arith.addf %432, %437 : vector<8x128xf32>
    %c1_413 = arith.constant 1 : index
    %c8_414 = arith.constant 8 : index
    %c0_415 = arith.constant 0 : index
    %439 = vector.load %arg2[%c1_413, %c8_414, %c0_415] : memref<2x40x128xf32, #tpu.memory_space<vmem>>, vector<1x8x128xf32>
    %440 = vector.shape_cast %439 : vector<1x8x128xf32> to vector<8x128xf32>
    %c3_416 = arith.constant 3 : index
    %c8_417 = arith.constant 8 : index
    %c0_418 = arith.constant 0 : index
    %441 = vector.load %arg3[%c3_416, %c8_417, %c0_418] : memref<8x40x128xf32, #tpu.memory_space<vmem>>, vector<1x8x128xf32>
    %442 = vector.shape_cast %441 : vector<1x8x128xf32> to vector<8x128xf32>
    %443 = arith.mulf %440, %442 : vector<8x128xf32>
    %444 = arith.addf %438, %443 : vector<8x128xf32>
    %c1_419 = arith.constant 1 : index
    %c16_420 = arith.constant 16 : index
    %c0_421 = arith.constant 0 : index
    %445 = vector.load %arg2[%c1_419, %c16_420, %c0_421] : memref<2x40x128xf32, #tpu.memory_space<vmem>>, vector<1x8x128xf32>
    %446 = vector.shape_cast %445 : vector<1x8x128xf32> to vector<8x128xf32>
    %c3_422 = arith.constant 3 : index
    %c16_423 = arith.constant 16 : index
    %c0_424 = arith.constant 0 : index
    %447 = vector.load %arg3[%c3_422, %c16_423, %c0_424] : memref<8x40x128xf32, #tpu.memory_space<vmem>>, vector<1x8x128xf32>
    %448 = vector.shape_cast %447 : vector<1x8x128xf32> to vector<8x128xf32>
    %449 = arith.mulf %446, %448 : vector<8x128xf32>
    %450 = arith.addf %444, %449 : vector<8x128xf32>
    %c1_425 = arith.constant 1 : index
    %c24_426 = arith.constant 24 : index
    %c0_427 = arith.constant 0 : index
    %451 = vector.load %arg2[%c1_425, %c24_426, %c0_427] : memref<2x40x128xf32, #tpu.memory_space<vmem>>, vector<1x8x128xf32>
    %452 = vector.shape_cast %451 : vector<1x8x128xf32> to vector<8x128xf32>
    %c3_428 = arith.constant 3 : index
    %c24_429 = arith.constant 24 : index
    %c0_430 = arith.constant 0 : index
    %453 = vector.load %arg3[%c3_428, %c24_429, %c0_430] : memref<8x40x128xf32, #tpu.memory_space<vmem>>, vector<1x8x128xf32>
    %454 = vector.shape_cast %453 : vector<1x8x128xf32> to vector<8x128xf32>
    %455 = arith.mulf %452, %454 : vector<8x128xf32>
    %456 = arith.addf %450, %455 : vector<8x128xf32>
    %c1_431 = arith.constant 1 : index
    %c32_432 = arith.constant 32 : index
    %c0_433 = arith.constant 0 : index
    %457 = vector.load %arg2[%c1_431, %c32_432, %c0_433] : memref<2x40x128xf32, #tpu.memory_space<vmem>>, vector<1x8x128xf32>
    %458 = vector.shape_cast %457 : vector<1x8x128xf32> to vector<8x128xf32>
    %c3_434 = arith.constant 3 : index
    %c32_435 = arith.constant 32 : index
    %c0_436 = arith.constant 0 : index
    %459 = vector.load %arg3[%c3_434, %c32_435, %c0_436] : memref<8x40x128xf32, #tpu.memory_space<vmem>>, vector<1x8x128xf32>
    %460 = vector.shape_cast %459 : vector<1x8x128xf32> to vector<8x128xf32>
    %461 = arith.mulf %458, %460 : vector<8x128xf32>
    %462 = arith.addf %456, %461 : vector<8x128xf32>
    %c1_437 = arith.constant 1 : index
    %c3_438 = arith.constant 3 : index
    %c0_439 = arith.constant 0 : index
    %463 = vector.load %arg6[%c1_437, %c3_438, %c0_439] : memref<2x8x128xf32, #tpu.memory_space<vmem>>, vector<1x1x128xf32>
    %464 = vector.shape_cast %463 : vector<1x1x128xf32> to vector<1x128xf32>
    %cst_440 = arith.constant dense<0.000000e+00> : vector<128xf32>
    %465 = vector.multi_reduction <add>, %462, %cst_440 [0] : vector<8x128xf32> to vector<128xf32>
    %466 = vector.shape_cast %465 : vector<128xf32> to vector<1x128xf32>
    %467 = arith.addf %464, %466 : vector<1x128xf32>
    %c1_441 = arith.constant 1 : index
    %c3_442 = arith.constant 3 : index
    %c0_443 = arith.constant 0 : index
    %468 = vector.load %arg6[%c1_441, %c3_442, %c0_443] : memref<2x8x128xf32, #tpu.memory_space<vmem>>, vector<1x1x128xf32>
    %469 = vector.shape_cast %468 : vector<1x1x128xf32> to vector<1x128xf32>
    %470 = vector.shape_cast %467 : vector<1x128xf32> to vector<1x1x128xf32>
    tpu.vector_store %arg6[%c1_441, %c3_442, %c0_443], %470 {strides = array<i32>} : memref<2x8x128xf32, #tpu.memory_space<vmem>>, vector<1x1x128xf32>,
    %cst_444 = arith.constant 0.000000e+00 : f32
    %471 = vector.broadcast %cst_444 : f32 to vector<8x128xf32>
    %c1_445 = arith.constant 1 : index
    %c0_446 = arith.constant 0 : index
    %c0_447 = arith.constant 0 : index
    %472 = vector.load %arg2[%c1_445, %c0_446, %c0_447] : memref<2x40x128xf32, #tpu.memory_space<vmem>>, vector<1x8x128xf32>
    %473 = vector.shape_cast %472 : vector<1x8x128xf32> to vector<8x128xf32>
    %c4_448 = arith.constant 4 : index
    %c0_449 = arith.constant 0 : index
    %c0_450 = arith.constant 0 : index
    %474 = vector.load %arg3[%c4_448, %c0_449, %c0_450] : memref<8x40x128xf32, #tpu.memory_space<vmem>>, vector<1x8x128xf32>
    %475 = vector.shape_cast %474 : vector<1x8x128xf32> to vector<8x128xf32>
    %476 = arith.mulf %473, %475 : vector<8x128xf32>
    %477 = arith.addf %471, %476 : vector<8x128xf32>
    %c1_451 = arith.constant 1 : index
    %c8_452 = arith.constant 8 : index
    %c0_453 = arith.constant 0 : index
    %478 = vector.load %arg2[%c1_451, %c8_452, %c0_453] : memref<2x40x128xf32, #tpu.memory_space<vmem>>, vector<1x8x128xf32>
    %479 = vector.shape_cast %478 : vector<1x8x128xf32> to vector<8x128xf32>
    %c4_454 = arith.constant 4 : index
    %c8_455 = arith.constant 8 : index
    %c0_456 = arith.constant 0 : index
    %480 = vector.load %arg3[%c4_454, %c8_455, %c0_456] : memref<8x40x128xf32, #tpu.memory_space<vmem>>, vector<1x8x128xf32>
    %481 = vector.shape_cast %480 : vector<1x8x128xf32> to vector<8x128xf32>
    %482 = arith.mulf %479, %481 : vector<8x128xf32>
    %483 = arith.addf %477, %482 : vector<8x128xf32>
    %c1_457 = arith.constant 1 : index
    %c16_458 = arith.constant 16 : index
    %c0_459 = arith.constant 0 : index
    %484 = vector.load %arg2[%c1_457, %c16_458, %c0_459] : memref<2x40x128xf32, #tpu.memory_space<vmem>>, vector<1x8x128xf32>
    %485 = vector.shape_cast %484 : vector<1x8x128xf32> to vector<8x128xf32>
    %c4_460 = arith.constant 4 : index
    %c16_461 = arith.constant 16 : index
    %c0_462 = arith.constant 0 : index
    %486 = vector.load %arg3[%c4_460, %c16_461, %c0_462] : memref<8x40x128xf32, #tpu.memory_space<vmem>>, vector<1x8x128xf32>
    %487 = vector.shape_cast %486 : vector<1x8x128xf32> to vector<8x128xf32>
    %488 = arith.mulf %485, %487 : vector<8x128xf32>
    %489 = arith.addf %483, %488 : vector<8x128xf32>
    %c1_463 = arith.constant 1 : index
    %c24_464 = arith.constant 24 : index
    %c0_465 = arith.constant 0 : index
    %490 = vector.load %arg2[%c1_463, %c24_464, %c0_465] : memref<2x40x128xf32, #tpu.memory_space<vmem>>, vector<1x8x128xf32>
    %491 = vector.shape_cast %490 : vector<1x8x128xf32> to vector<8x128xf32>
    %c4_466 = arith.constant 4 : index
    %c24_467 = arith.constant 24 : index
    %c0_468 = arith.constant 0 : index
    %492 = vector.load %arg3[%c4_466, %c24_467, %c0_468] : memref<8x40x128xf32, #tpu.memory_space<vmem>>, vector<1x8x128xf32>
    %493 = vector.shape_cast %492 : vector<1x8x128xf32> to vector<8x128xf32>
    %494 = arith.mulf %491, %493 : vector<8x128xf32>
    %495 = arith.addf %489, %494 : vector<8x128xf32>
    %c1_469 = arith.constant 1 : index
    %c32_470 = arith.constant 32 : index
    %c0_471 = arith.constant 0 : index
    %496 = vector.load %arg2[%c1_469, %c32_470, %c0_471] : memref<2x40x128xf32, #tpu.memory_space<vmem>>, vector<1x8x128xf32>
    %497 = vector.shape_cast %496 : vector<1x8x128xf32> to vector<8x128xf32>
    %c4_472 = arith.constant 4 : index
    %c32_473 = arith.constant 32 : index
    %c0_474 = arith.constant 0 : index
    %498 = vector.load %arg3[%c4_472, %c32_473, %c0_474] : memref<8x40x128xf32, #tpu.memory_space<vmem>>, vector<1x8x128xf32>
    %499 = vector.shape_cast %498 : vector<1x8x128xf32> to vector<8x128xf32>
    %500 = arith.mulf %497, %499 : vector<8x128xf32>
    %501 = arith.addf %495, %500 : vector<8x128xf32>
    %c1_475 = arith.constant 1 : index
    %c4_476 = arith.constant 4 : index
    %c0_477 = arith.constant 0 : index
    %502 = vector.load %arg6[%c1_475, %c4_476, %c0_477] : memref<2x8x128xf32, #tpu.memory_space<vmem>>, vector<1x1x128xf32>
    %503 = vector.shape_cast %502 : vector<1x1x128xf32> to vector<1x128xf32>
    %cst_478 = arith.constant dense<0.000000e+00> : vector<128xf32>
    %504 = vector.multi_reduction <add>, %501, %cst_478 [0] : vector<8x128xf32> to vector<128xf32>
    %505 = vector.shape_cast %504 : vector<128xf32> to vector<1x128xf32>
    %506 = arith.addf %503, %505 : vector<1x128xf32>
    %c1_479 = arith.constant 1 : index
    %c4_480 = arith.constant 4 : index
    %c0_481 = arith.constant 0 : index
    %507 = vector.load %arg6[%c1_479, %c4_480, %c0_481] : memref<2x8x128xf32, #tpu.memory_space<vmem>>, vector<1x1x128xf32>
    %508 = vector.shape_cast %507 : vector<1x1x128xf32> to vector<1x128xf32>
    %509 = vector.shape_cast %506 : vector<1x128xf32> to vector<1x1x128xf32>
    tpu.vector_store %arg6[%c1_479, %c4_480, %c0_481], %509 {strides = array<i32>} : memref<2x8x128xf32, #tpu.memory_space<vmem>>, vector<1x1x128xf32>,
    %cst_482 = arith.constant 0.000000e+00 : f32
    %510 = vector.broadcast %cst_482 : f32 to vector<8x128xf32>
    %c1_483 = arith.constant 1 : index
    %c0_484 = arith.constant 0 : index
    %c0_485 = arith.constant 0 : index
    %511 = vector.load %arg2[%c1_483, %c0_484, %c0_485] : memref<2x40x128xf32, #tpu.memory_space<vmem>>, vector<1x8x128xf32>
    %512 = vector.shape_cast %511 : vector<1x8x128xf32> to vector<8x128xf32>
    %c5_486 = arith.constant 5 : index
    %c0_487 = arith.constant 0 : index
    %c0_488 = arith.constant 0 : index
    %513 = vector.load %arg3[%c5_486, %c0_487, %c0_488] : memref<8x40x128xf32, #tpu.memory_space<vmem>>, vector<1x8x128xf32>
    %514 = vector.shape_cast %513 : vector<1x8x128xf32> to vector<8x128xf32>
    %515 = arith.mulf %512, %514 : vector<8x128xf32>
    %516 = arith.addf %510, %515 : vector<8x128xf32>
    %c1_489 = arith.constant 1 : index
    %c8_490 = arith.constant 8 : index
    %c0_491 = arith.constant 0 : index
    %517 = vector.load %arg2[%c1_489, %c8_490, %c0_491] : memref<2x40x128xf32, #tpu.memory_space<vmem>>, vector<1x8x128xf32>
    %518 = vector.shape_cast %517 : vector<1x8x128xf32> to vector<8x128xf32>
    %c5_492 = arith.constant 5 : index
    %c8_493 = arith.constant 8 : index
    %c0_494 = arith.constant 0 : index
    %519 = vector.load %arg3[%c5_492, %c8_493, %c0_494] : memref<8x40x128xf32, #tpu.memory_space<vmem>>, vector<1x8x128xf32>
    %520 = vector.shape_cast %519 : vector<1x8x128xf32> to vector<8x128xf32>
    %521 = arith.mulf %518, %520 : vector<8x128xf32>
    %522 = arith.addf %516, %521 : vector<8x128xf32>
    %c1_495 = arith.constant 1 : index
    %c16_496 = arith.constant 16 : index
    %c0_497 = arith.constant 0 : index
    %523 = vector.load %arg2[%c1_495, %c16_496, %c0_497] : memref<2x40x128xf32, #tpu.memory_space<vmem>>, vector<1x8x128xf32>
    %524 = vector.shape_cast %523 : vector<1x8x128xf32> to vector<8x128xf32>
    %c5_498 = arith.constant 5 : index
    %c16_499 = arith.constant 16 : index
    %c0_500 = arith.constant 0 : index
    %525 = vector.load %arg3[%c5_498, %c16_499, %c0_500] : memref<8x40x128xf32, #tpu.memory_space<vmem>>, vector<1x8x128xf32>
    %526 = vector.shape_cast %525 : vector<1x8x128xf32> to vector<8x128xf32>
    %527 = arith.mulf %524, %526 : vector<8x128xf32>
    %528 = arith.addf %522, %527 : vector<8x128xf32>
    %c1_501 = arith.constant 1 : index
    %c24_502 = arith.constant 24 : index
    %c0_503 = arith.constant 0 : index
    %529 = vector.load %arg2[%c1_501, %c24_502, %c0_503] : memref<2x40x128xf32, #tpu.memory_space<vmem>>, vector<1x8x128xf32>
    %530 = vector.shape_cast %529 : vector<1x8x128xf32> to vector<8x128xf32>
    %c5_504 = arith.constant 5 : index
    %c24_505 = arith.constant 24 : index
    %c0_506 = arith.constant 0 : index
    %531 = vector.load %arg3[%c5_504, %c24_505, %c0_506] : memref<8x40x128xf32, #tpu.memory_space<vmem>>, vector<1x8x128xf32>
    %532 = vector.shape_cast %531 : vector<1x8x128xf32> to vector<8x128xf32>
    %533 = arith.mulf %530, %532 : vector<8x128xf32>
    %534 = arith.addf %528, %533 : vector<8x128xf32>
    %c1_507 = arith.constant 1 : index
    %c32_508 = arith.constant 32 : index
    %c0_509 = arith.constant 0 : index
    %535 = vector.load %arg2[%c1_507, %c32_508, %c0_509] : memref<2x40x128xf32, #tpu.memory_space<vmem>>, vector<1x8x128xf32>
    %536 = vector.shape_cast %535 : vector<1x8x128xf32> to vector<8x128xf32>
    %c5_510 = arith.constant 5 : index
    %c32_511 = arith.constant 32 : index
    %c0_512 = arith.constant 0 : index
    %537 = vector.load %arg3[%c5_510, %c32_511, %c0_512] : memref<8x40x128xf32, #tpu.memory_space<vmem>>, vector<1x8x128xf32>
    %538 = vector.shape_cast %537 : vector<1x8x128xf32> to vector<8x128xf32>
    %539 = arith.mulf %536, %538 : vector<8x128xf32>
    %540 = arith.addf %534, %539 : vector<8x128xf32>
    %c1_513 = arith.constant 1 : index
    %c5_514 = arith.constant 5 : index
    %c0_515 = arith.constant 0 : index
    %541 = vector.load %arg6[%c1_513, %c5_514, %c0_515] : memref<2x8x128xf32, #tpu.memory_space<vmem>>, vector<1x1x128xf32>
    %542 = vector.shape_cast %541 : vector<1x1x128xf32> to vector<1x128xf32>
    %cst_516 = arith.constant dense<0.000000e+00> : vector<128xf32>
    %543 = vector.multi_reduction <add>, %540, %cst_516 [0] : vector<8x128xf32> to vector<128xf32>
    %544 = vector.shape_cast %543 : vector<128xf32> to vector<1x128xf32>
    %545 = arith.addf %542, %544 : vector<1x128xf32>
    %c1_517 = arith.constant 1 : index
    %c5_518 = arith.constant 5 : index
    %c0_519 = arith.constant 0 : index
    %546 = vector.load %arg6[%c1_517, %c5_518, %c0_519] : memref<2x8x128xf32, #tpu.memory_space<vmem>>, vector<1x1x128xf32>
    %547 = vector.shape_cast %546 : vector<1x1x128xf32> to vector<1x128xf32>
    %548 = vector.shape_cast %545 : vector<1x128xf32> to vector<1x1x128xf32>
    tpu.vector_store %arg6[%c1_517, %c5_518, %c0_519], %548 {strides = array<i32>} : memref<2x8x128xf32, #tpu.memory_space<vmem>>, vector<1x1x128xf32>,
    %cst_520 = arith.constant 0.000000e+00 : f32
    %549 = vector.broadcast %cst_520 : f32 to vector<8x128xf32>
    %c1_521 = arith.constant 1 : index
    %c0_522 = arith.constant 0 : index
    %c0_523 = arith.constant 0 : index
    %550 = vector.load %arg2[%c1_521, %c0_522, %c0_523] : memref<2x40x128xf32, #tpu.memory_space<vmem>>, vector<1x8x128xf32>
    %551 = vector.shape_cast %550 : vector<1x8x128xf32> to vector<8x128xf32>
    %c6_524 = arith.constant 6 : index
    %c0_525 = arith.constant 0 : index
    %c0_526 = arith.constant 0 : index
    %552 = vector.load %arg3[%c6_524, %c0_525, %c0_526] : memref<8x40x128xf32, #tpu.memory_space<vmem>>, vector<1x8x128xf32>
    %553 = vector.shape_cast %552 : vector<1x8x128xf32> to vector<8x128xf32>
    %554 = arith.mulf %551, %553 : vector<8x128xf32>
    %555 = arith.addf %549, %554 : vector<8x128xf32>
    %c1_527 = arith.constant 1 : index
    %c8_528 = arith.constant 8 : index
    %c0_529 = arith.constant 0 : index
    %556 = vector.load %arg2[%c1_527, %c8_528, %c0_529] : memref<2x40x128xf32, #tpu.memory_space<vmem>>, vector<1x8x128xf32>
    %557 = vector.shape_cast %556 : vector<1x8x128xf32> to vector<8x128xf32>
    %c6_530 = arith.constant 6 : index
    %c8_531 = arith.constant 8 : index
    %c0_532 = arith.constant 0 : index
    %558 = vector.load %arg3[%c6_530, %c8_531, %c0_532] : memref<8x40x128xf32, #tpu.memory_space<vmem>>, vector<1x8x128xf32>
    %559 = vector.shape_cast %558 : vector<1x8x128xf32> to vector<8x128xf32>
    %560 = arith.mulf %557, %559 : vector<8x128xf32>
    %561 = arith.addf %555, %560 : vector<8x128xf32>
    %c1_533 = arith.constant 1 : index
    %c16_534 = arith.constant 16 : index
    %c0_535 = arith.constant 0 : index
    %562 = vector.load %arg2[%c1_533, %c16_534, %c0_535] : memref<2x40x128xf32, #tpu.memory_space<vmem>>, vector<1x8x128xf32>
    %563 = vector.shape_cast %562 : vector<1x8x128xf32> to vector<8x128xf32>
    %c6_536 = arith.constant 6 : index
    %c16_537 = arith.constant 16 : index
    %c0_538 = arith.constant 0 : index
    %564 = vector.load %arg3[%c6_536, %c16_537, %c0_538] : memref<8x40x128xf32, #tpu.memory_space<vmem>>, vector<1x8x128xf32>
    %565 = vector.shape_cast %564 : vector<1x8x128xf32> to vector<8x128xf32>
    %566 = arith.mulf %563, %565 : vector<8x128xf32>
    %567 = arith.addf %561, %566 : vector<8x128xf32>
    %c1_539 = arith.constant 1 : index
    %c24_540 = arith.constant 24 : index
    %c0_541 = arith.constant 0 : index
    %568 = vector.load %arg2[%c1_539, %c24_540, %c0_541] : memref<2x40x128xf32, #tpu.memory_space<vmem>>, vector<1x8x128xf32>
    %569 = vector.shape_cast %568 : vector<1x8x128xf32> to vector<8x128xf32>
    %c6_542 = arith.constant 6 : index
    %c24_543 = arith.constant 24 : index
    %c0_544 = arith.constant 0 : index
    %570 = vector.load %arg3[%c6_542, %c24_543, %c0_544] : memref<8x40x128xf32, #tpu.memory_space<vmem>>, vector<1x8x128xf32>
    %571 = vector.shape_cast %570 : vector<1x8x128xf32> to vector<8x128xf32>
    %572 = arith.mulf %569, %571 : vector<8x128xf32>
    %573 = arith.addf %567, %572 : vector<8x128xf32>
    %c1_545 = arith.constant 1 : index
    %c32_546 = arith.constant 32 : index
    %c0_547 = arith.constant 0 : index
    %574 = vector.load %arg2[%c1_545, %c32_546, %c0_547] : memref<2x40x128xf32, #tpu.memory_space<vmem>>, vector<1x8x128xf32>
    %575 = vector.shape_cast %574 : vector<1x8x128xf32> to vector<8x128xf32>
    %c6_548 = arith.constant 6 : index
    %c32_549 = arith.constant 32 : index
    %c0_550 = arith.constant 0 : index
    %576 = vector.load %arg3[%c6_548, %c32_549, %c0_550] : memref<8x40x128xf32, #tpu.memory_space<vmem>>, vector<1x8x128xf32>
    %577 = vector.shape_cast %576 : vector<1x8x128xf32> to vector<8x128xf32>
    %578 = arith.mulf %575, %577 : vector<8x128xf32>
    %579 = arith.addf %573, %578 : vector<8x128xf32>
    %c1_551 = arith.constant 1 : index
    %c6_552 = arith.constant 6 : index
    %c0_553 = arith.constant 0 : index
    %580 = vector.load %arg6[%c1_551, %c6_552, %c0_553] : memref<2x8x128xf32, #tpu.memory_space<vmem>>, vector<1x1x128xf32>
    %581 = vector.shape_cast %580 : vector<1x1x128xf32> to vector<1x128xf32>
    %cst_554 = arith.constant dense<0.000000e+00> : vector<128xf32>
    %582 = vector.multi_reduction <add>, %579, %cst_554 [0] : vector<8x128xf32> to vector<128xf32>
    %583 = vector.shape_cast %582 : vector<128xf32> to vector<1x128xf32>
    %584 = arith.addf %581, %583 : vector<1x128xf32>
    %c1_555 = arith.constant 1 : index
    %c6_556 = arith.constant 6 : index
    %c0_557 = arith.constant 0 : index
    %585 = vector.load %arg6[%c1_555, %c6_556, %c0_557] : memref<2x8x128xf32, #tpu.memory_space<vmem>>, vector<1x1x128xf32>
    %586 = vector.shape_cast %585 : vector<1x1x128xf32> to vector<1x128xf32>
    %587 = vector.shape_cast %584 : vector<1x128xf32> to vector<1x1x128xf32>
    tpu.vector_store %arg6[%c1_555, %c6_556, %c0_557], %587 {strides = array<i32>} : memref<2x8x128xf32, #tpu.memory_space<vmem>>, vector<1x1x128xf32>,
    %cst_558 = arith.constant 0.000000e+00 : f32
    %588 = vector.broadcast %cst_558 : f32 to vector<8x128xf32>
    %c1_559 = arith.constant 1 : index
    %c0_560 = arith.constant 0 : index
    %c0_561 = arith.constant 0 : index
    %589 = vector.load %arg2[%c1_559, %c0_560, %c0_561] : memref<2x40x128xf32, #tpu.memory_space<vmem>>, vector<1x8x128xf32>
    %590 = vector.shape_cast %589 : vector<1x8x128xf32> to vector<8x128xf32>
    %c7_562 = arith.constant 7 : index
    %c0_563 = arith.constant 0 : index
    %c0_564 = arith.constant 0 : index
    %591 = vector.load %arg3[%c7_562, %c0_563, %c0_564] : memref<8x40x128xf32, #tpu.memory_space<vmem>>, vector<1x8x128xf32>
    %592 = vector.shape_cast %591 : vector<1x8x128xf32> to vector<8x128xf32>
    %593 = arith.mulf %590, %592 : vector<8x128xf32>
    %594 = arith.addf %588, %593 : vector<8x128xf32>
    %c1_565 = arith.constant 1 : index
    %c8_566 = arith.constant 8 : index
    %c0_567 = arith.constant 0 : index
    %595 = vector.load %arg2[%c1_565, %c8_566, %c0_567] : memref<2x40x128xf32, #tpu.memory_space<vmem>>, vector<1x8x128xf32>
    %596 = vector.shape_cast %595 : vector<1x8x128xf32> to vector<8x128xf32>
    %c7_568 = arith.constant 7 : index
    %c8_569 = arith.constant 8 : index
    %c0_570 = arith.constant 0 : index
    %597 = vector.load %arg3[%c7_568, %c8_569, %c0_570] : memref<8x40x128xf32, #tpu.memory_space<vmem>>, vector<1x8x128xf32>
    %598 = vector.shape_cast %597 : vector<1x8x128xf32> to vector<8x128xf32>
    %599 = arith.mulf %596, %598 : vector<8x128xf32>
    %600 = arith.addf %594, %599 : vector<8x128xf32>
    %c1_571 = arith.constant 1 : index
    %c16_572 = arith.constant 16 : index
    %c0_573 = arith.constant 0 : index
    %601 = vector.load %arg2[%c1_571, %c16_572, %c0_573] : memref<2x40x128xf32, #tpu.memory_space<vmem>>, vector<1x8x128xf32>
    %602 = vector.shape_cast %601 : vector<1x8x128xf32> to vector<8x128xf32>
    %c7_574 = arith.constant 7 : index
    %c16_575 = arith.constant 16 : index
    %c0_576 = arith.constant 0 : index
    %603 = vector.load %arg3[%c7_574, %c16_575, %c0_576] : memref<8x40x128xf32, #tpu.memory_space<vmem>>, vector<1x8x128xf32>
    %604 = vector.shape_cast %603 : vector<1x8x128xf32> to vector<8x128xf32>
    %605 = arith.mulf %602, %604 : vector<8x128xf32>
    %606 = arith.addf %600, %605 : vector<8x128xf32>
    %c1_577 = arith.constant 1 : index
    %c24_578 = arith.constant 24 : index
    %c0_579 = arith.constant 0 : index
    %607 = vector.load %arg2[%c1_577, %c24_578, %c0_579] : memref<2x40x128xf32, #tpu.memory_space<vmem>>, vector<1x8x128xf32>
    %608 = vector.shape_cast %607 : vector<1x8x128xf32> to vector<8x128xf32>
    %c7_580 = arith.constant 7 : index
    %c24_581 = arith.constant 24 : index
    %c0_582 = arith.constant 0 : index
    %609 = vector.load %arg3[%c7_580, %c24_581, %c0_582] : memref<8x40x128xf32, #tpu.memory_space<vmem>>, vector<1x8x128xf32>
    %610 = vector.shape_cast %609 : vector<1x8x128xf32> to vector<8x128xf32>
    %611 = arith.mulf %608, %610 : vector<8x128xf32>
    %612 = arith.addf %606, %611 : vector<8x128xf32>
    %c1_583 = arith.constant 1 : index
    %c32_584 = arith.constant 32 : index
    %c0_585 = arith.constant 0 : index
    %613 = vector.load %arg2[%c1_583, %c32_584, %c0_585] : memref<2x40x128xf32, #tpu.memory_space<vmem>>, vector<1x8x128xf32>
    %614 = vector.shape_cast %613 : vector<1x8x128xf32> to vector<8x128xf32>
    %c7_586 = arith.constant 7 : index
    %c32_587 = arith.constant 32 : index
    %c0_588 = arith.constant 0 : index
    %615 = vector.load %arg3[%c7_586, %c32_587, %c0_588] : memref<8x40x128xf32, #tpu.memory_space<vmem>>, vector<1x8x128xf32>
    %616 = vector.shape_cast %615 : vector<1x8x128xf32> to vector<8x128xf32>
    %617 = arith.mulf %614, %616 : vector<8x128xf32>
    %618 = arith.addf %612, %617 : vector<8x128xf32>
    %c1_589 = arith.constant 1 : index
    %c7_590 = arith.constant 7 : index
    %c0_591 = arith.constant 0 : index
    %619 = vector.load %arg6[%c1_589, %c7_590, %c0_591] : memref<2x8x128xf32, #tpu.memory_space<vmem>>, vector<1x1x128xf32>
    %620 = vector.shape_cast %619 : vector<1x1x128xf32> to vector<1x128xf32>
    %cst_592 = arith.constant dense<0.000000e+00> : vector<128xf32>
    %621 = vector.multi_reduction <add>, %618, %cst_592 [0] : vector<8x128xf32> to vector<128xf32>
    %622 = vector.shape_cast %621 : vector<128xf32> to vector<1x128xf32>
    %623 = arith.addf %620, %622 : vector<1x128xf32>
    %c1_593 = arith.constant 1 : index
    %c7_594 = arith.constant 7 : index
    %c0_595 = arith.constant 0 : index
    %624 = vector.load %arg6[%c1_593, %c7_594, %c0_595] : memref<2x8x128xf32, #tpu.memory_space<vmem>>, vector<1x1x128xf32>
    %625 = vector.shape_cast %624 : vector<1x1x128xf32> to vector<1x128xf32>
    %626 = vector.shape_cast %623 : vector<1x128xf32> to vector<1x1x128xf32>
    tpu.vector_store %arg6[%c1_593, %c7_594, %c0_595], %626 {strides = array<i32>} : memref<2x8x128xf32, #tpu.memory_space<vmem>>, vector<1x1x128xf32>,
    %c0_i32_596 = arith.constant 0 : i32
    %627 = arith.cmpi eq, %arg1, %c0_i32_596 : i32
    %628 = arith.extui %627 : i1 to i32
    %c0_i32_597 = arith.constant 0 : i32
    %629 = arith.cmpi ne, %628, %c0_i32_597 : i32
    scf.if %629 {
      %c0_598 = arith.constant 0 : index
      %c0_599 = arith.constant 0 : index
      %c0_600 = arith.constant 0 : index
      %630 = vector.load %arg6[%c0_598, %c0_599, %c0_600] : memref<2x8x128xf32, #tpu.memory_space<vmem>>, vector<2x8x128xf32>
      %c0_601 = arith.constant 0 : index
      %c0_602 = arith.constant 0 : index
      %631 = vector.load %arg4[%c0_601, %c0_602] : memref<8x128xf32, #tpu.memory_space<vmem>>, vector<8x128xf32>
      %632 = vector.shape_cast %631 : vector<8x128xf32> to vector<1x8x128xf32>
      %633 = vector.broadcast %632 : vector<1x8x128xf32> to vector<2x8x128xf32>
      %634 = arith.addf %630, %633 : vector<2x8x128xf32>
      %c0_603 = arith.constant 0 : index
      %c0_604 = arith.constant 0 : index
      %c0_605 = arith.constant 0 : index
      %635 = vector.load %arg5[%c0_603, %c0_604, %c0_605] : memref<2x8x128xf32, #tpu.memory_space<vmem>>, vector<2x8x128xf32>
      tpu.vector_store %arg5[%c0_603, %c0_604, %c0_605], %634 {strides = array<i32>} : memref<2x8x128xf32, #tpu.memory_space<vmem>>, vector<2x8x128xf32>,
    } else {
    }
    return
  }
  func.func @transform_0(%arg0: i32, %arg1: i32) -> (i32, i32, i32) {
    %c0_i32 = arith.constant 0 : i32
    %c0_i32_0 = arith.constant 0 : i32
    return %c0_i32, %arg1, %arg0 : i32, i32, i32
  }
  func.func @transform_1(%arg0: i32, %arg1: i32) -> (i32, i32, i32) {
    %c0_i32 = arith.constant 0 : i32
    %c0_i32_0 = arith.constant 0 : i32
    return %c0_i32, %arg1, %arg0 : i32, i32, i32
  }
  func.func @transform_2(%arg0: i32, %arg1: i32) -> (i32, i32) {
    %c0_i32 = arith.constant 0 : i32
    %c0_i32_0 = arith.constant 0 : i32
    return %c0_i32, %arg0 : i32, i32
  }
  func.func @transform_3(%arg0: i32, %arg1: i32) -> (i32, i32, i32) {
    %c0_i32 = arith.constant 0 : i32
    %c0_i32_0 = arith.constant 0 : i32
    %c0_i32_1 = arith.constant 0 : i32
    return %c0_i32, %c0_i32_0, %arg0 : i32, i32, i32
  }
}

</mosaic_0001>

<bundles_post_ra>
// kernel: lc2d_apply.1
= control target key start
LH: loop header
LB: loop body
LE: loop exit
PB: predicated region body
PF: predicated region fallthrough
CT: control target
= control target key end

     0   :  { %s1348_s12 = smov 0   ;;  %s1350_s13 = smov 0   ;;  %s1852_s0 = inlined_call_operand.vmem [shape: f32[2,40,256], index: 0, kind: input, shape index: {}]   ;;  %s1853_s1 = inlined_call_operand.vmem [shape: f32[8,40,256], index: 1, kind: input, shape index: {}]   ;;  %s1854_s2 = inlined_call_operand.vmem [shape: f32[8,256], index: 2, kind: input, shape index: {}]   ;;  %s1855_s3 = inlined_call_operand.vmem [shape: f32[2,8,256], index: 3, kind: output, shape index: {}]  }
   0x1   :  { %s1352_s14 = smov 0   ;;  %s1354_s15 = smov 0  }
   0x2   :  { %s1356_s16 = smov 0  }
   0x3 LB: > { %s25_s17 = sadd.s32 1, %s1321_s15  ;;  %s1119_s18 = sadd.s32 4294967295, %s1325_s16   ;;  %s1325_s16 = sphi %s1356_s16, %s13_s16   ;;  %s1321_s15 = sphi %s1354_s15, %s1879_s15   ;;  %s1317_s14 = sphi %s1352_s14, %s1878_s14   ;;  %s1313_s13 = sphi %s1350_s13, %s1877_s13   ;;  %s1309_s12 = sphi %s1348_s12, %s1876_s12  }
   0x4   : > { %p27_p0 = scmp.ge.s32.totalorder %s25_s17, 2  ;;  %p41_p1 = scmp.ne.s32.totalorder %s1313_s13, %s1309_s12 }
   0x5   : > { %p42_p2 = scmp.eq.s32.totalorder %s1325_s16, 0  ;;  %p125_p4 = scmp.eq.s32.totalorder %s1119_s18, 1 }
   0x6   : > { %s1881_s17 = smov (%p27_p0, %s25_s17), 0  ;;  %s34_s21 = sadd.s32 1, %s1313_s13 }
   0x7   : > { %p1380_p3 = por %p42_p2, %p41_p1  ;;  %s30_s20 = ssub.s32 %s1321_s15, %s1881_s17 }
   0x8   : > { %p32_p5 = scmp.eq.s32.totalorder %s30_s20, 0  ;;  %p1387_p6 = por %p125_p4, %p41_p1 }
   0x9   : > { %p1122_p7 = scmp.ge.s32.totalorder %s1325_s16, 2 }
   0xa   : > { %s1392_s23 = scalar_select %p32_p5, %s1313_s13, %s34_s21  }
   0xb   : > { %147 = sbr.rel (%p1122_p7) target bundleno = 51 (0x33), region = 16 }
  0x12   : > { %150 = sbr.rel (!%p1380_p3) target bundleno = 27 (0x1b), region = 20  ;;  %s152_s24 = sand.u32 (%p1380_p3), 1, %s1313_s13  }
  0x13   : > { %s1123_s25 = sshll.u32 (%p1380_p3), %s1321_s15, 3  ;;  %s1242_s26 = smul.u32 (%p1380_p3), 80, %s152_s24 }
  0x14   : > { %s159_s29 = scalar_lea.vmem (%p1380_p3), %s1852_s0, %s1123_s25 }
  0x15   : > { %v205_v0 = vld [vmem:[%s159_s29] sm:$0xff] (%p1380_p3)  ;;  %v207_v1 = vld [vmem:[%s159_s29 + $0x10] sm:$0xff] (%p1380_p3)  ;;  %s154_s30 = scalar_lea.vmem (%p1380_p3), [#allocation3], %s1242_s26 }
  0x16   : > { %v209_v2 = vld [vmem:[%s159_s29 + $0x20] sm:$0xff] (%p1380_p3)  ;;  %v211_v3 = vld [vmem:[%s159_s29 + $0x30] sm:$0xff] (%p1380_p3)  ;;  %206 = vst [vmem:[%s154_s30] sm:$0xff] (%p1380_p3), %v205_v0  ;;  %208 = vst [vmem:[%s154_s30 + $0x8] sm:$0xff] (%p1380_p3), %v207_v1 }
  0x17   : > { %v213_v4 = vld [vmem:[%s159_s29 + $0x40] sm:$0xff] (%p1380_p3)  ;;  %v215_v5 = vld [vmem:[%s159_s29 + $0x50] sm:$0xff] (%p1380_p3)  ;;  %210 = vst [vmem:[%s154_s30 + $0x10] sm:$0xff] (%p1380_p3), %v209_v2  ;;  %212 = vst [vmem:[%s154_s30 + $0x18] sm:$0xff] (%p1380_p3), %v211_v3 }
  0x18   : > { %214 = vst [vmem:[%s154_s30 + $0x20] sm:$0xff] (%p1380_p3), %v213_v4  ;;  %216 = vst [vmem:[%s154_s30 + $0x28] sm:$0xff] (%p1380_p3), %v215_v5  ;;  %v217_v6 = vld [vmem:[%s159_s29 + $0x60] sm:$0xff] (%p1380_p3)  ;;  %v219_v7 = vld [vmem:[%s159_s29 + $0x70] sm:$0xff] (%p1380_p3) }
  0x19   : > { %v221_v8 = vld [vmem:[%s159_s29 + $0x80] sm:$0xff]  ;;  %218 = vst [vmem:[%s154_s30 + $0x30] sm:$0xff] %v217_v6  ;;  %220 = vst [vmem:[%s154_s30 + $0x38] sm:$0xff] %v219_v7  ;;  %v223_v9 = vld [vmem:[%s159_s29 + $0x90] sm:$0xff] }
  0x1a   : > { %222 = vst [vmem:[%s154_s30 + $0x40] sm:$0xff] %v221_v8  ;;  %224 = vst [vmem:[%s154_s30 + $0x48] sm:$0xff] %v223_v9 }
  0x1b PF: > { %230 = sbr.rel (!%p1380_p3) target bundleno = 51 (0x33), region = 58  ;;  %s232_s4 = sand.u32 (%p1380_p3), 1, %s1313_s13  }
  0x1c   : > { %s1124_s5 = sshll.u32 (%p1380_p3), %s1321_s15, 3  ;;  %s1243_s6 = smul.u32 (%p1380_p3), 320, %s232_s4 }
  0x1d   : > { %s1409_s9 = scalar_lea.vmem (%p1380_p3), %s1853_s1, %s1124_s5 }
  0x1e   : > { %v345_v10 = vld [vmem:[%s1409_s9] sm:$0xff] (%p1380_p3)  ;;  %v347_v11 = vld [vmem:[%s1409_s9 + $0x10] sm:$0xff] (%p1380_p3)  ;;  %s1417_s10 = scalar_lea.vmem (%p1380_p3), [#allocation4], %s1243_s6 }
  0x1f   : > { %v349_v12 = vld [vmem:[%s1409_s9 + $0x20] sm:$0xff] (%p1380_p3)  ;;  %v351_v13 = vld [vmem:[%s1409_s9 + $0x30] sm:$0xff] (%p1380_p3)  ;;  %346 = vst [vmem:[%s1417_s10] sm:$0xff] (%p1380_p3), %v345_v10  ;;  %348 = vst [vmem:[%s1417_s10 + $0x8] sm:$0xff] (%p1380_p3), %v347_v11 }
  0x20   : > { %v353_v14 = vld [vmem:[%s1409_s9 + $0x40] sm:$0xff] (%p1380_p3)  ;;  %v355_v15 = vld [vmem:[%s1409_s9 + $0x50] sm:$0xff] (%p1380_p3)  ;;  %350 = vst [vmem:[%s1417_s10 + $0x10] sm:$0xff] (%p1380_p3), %v349_v12  ;;  %352 = vst [vmem:[%s1417_s10 + $0x18] sm:$0xff] (%p1380_p3), %v351_v13 }
  0x21   : > { %354 = vst [vmem:[%s1417_s10 + $0x20] sm:$0xff] (%p1380_p3), %v353_v14  ;;  %356 = vst [vmem:[%s1417_s10 + $0x28] sm:$0xff] (%p1380_p3), %v355_v15  ;;  %v357_v16 = vld [vmem:[%s1409_s9 + $0x60] sm:$0xff] (%p1380_p3)  ;;  %v359_v17 = vld [vmem:[%s1409_s9 + $0x70] sm:$0xff] (%p1380_p3) }
  0x22   : > { %v361_v18 = vld [vmem:[%s1409_s9 + $0x80] sm:$0xff]  ;;  %358 = vst [vmem:[%s1417_s10 + $0x30] sm:$0xff] %v357_v16  ;;  %360 = vst [vmem:[%s1417_s10 + $0x38] sm:$0xff] %v359_v17  ;;  %v363_v19 = vld [vmem:[%s1409_s9 + $0x90] sm:$0xff] }
  0x23   : > { %362 = vst [vmem:[%s1417_s10 + $0x40] sm:$0xff] %v361_v18  ;;  %v365_v20 = vld [vmem:[%s1409_s9 + $0xa0] sm:$0xff]  ;;  %v367_v21 = vld [vmem:[%s1409_s9 + $0xb0] sm:$0xff]  ;;  %364 = vst [vmem:[%s1417_s10 + $0x48] sm:$0xff] %v363_v19 }
  0x24   : > { %366 = vst [vmem:[%s1417_s10 + $0x50] sm:$0xff] %v365_v20  ;;  %368 = vst [vmem:[%s1417_s10 + $0x58] sm:$0xff] %v367_v21  ;;  %v369_v22 = vld [vmem:[%s1409_s9 + $0xc0] sm:$0xff]  ;;  %v371_v23 = vld [vmem:[%s1409_s9 + $0xd0] sm:$0xff] }
  0x25   : > { %v373_v24 = vld [vmem:[%s1409_s9 + $0xe0] sm:$0xff]  ;;  %370 = vst [vmem:[%s1417_s10 + $0x60] sm:$0xff] %v369_v22  ;;  %372 = vst [vmem:[%s1417_s10 + $0x68] sm:$0xff] %v371_v23  ;;  %v375_v25 = vld [vmem:[%s1409_s9 + $0xf0] sm:$0xff] }
  0x26   : > { %374 = vst [vmem:[%s1417_s10 + $0x70] sm:$0xff] %v373_v24  ;;  %v377_v26 = vld [vmem:[%s1409_s9 + $0x100] sm:$0xff]  ;;  %v379_v27 = vld [vmem:[%s1409_s9 + $0x110] sm:$0xff]  ;;  %376 = vst [vmem:[%s1417_s10 + $0x78] sm:$0xff] %v375_v25 }
  0x27   : > { %378 = vst [vmem:[%s1417_s10 + $0x80] sm:$0xff] %v377_v26  ;;  %380 = vst [vmem:[%s1417_s10 + $0x88] sm:$0xff] %v379_v27  ;;  %v381_v28 = vld [vmem:[%s1409_s9 + $0x120] sm:$0xff]  ;;  %v383_v29 = vld [vmem:[%s1409_s9 + $0x130] sm:$0xff] }
  0x28   : > { %v385_v30 = vld [vmem:[%s1409_s9 + $0x140] sm:$0xff]  ;;  %382 = vst [vmem:[%s1417_s10 + $0x90] sm:$0xff] %v381_v28  ;;  %384 = vst [vmem:[%s1417_s10 + $0x98] sm:$0xff] %v383_v29  ;;  %v387_v31 = vld [vmem:[%s1409_s9 + $0x150] sm:$0xff] }
  0x29   : > { %386 = vst [vmem:[%s1417_s10 + $0xa0] sm:$0xff] %v385_v30  ;;  %v389_v32 = vld [vmem:[%s1409_s9 + $0x160] sm:$0xff]  ;;  %v391_v33 = vld [vmem:[%s1409_s9 + $0x170] sm:$0xff]  ;;  %388 = vst [vmem:[%s1417_s10 + $0xa8] sm:$0xff] %v387_v31 }
  0x2a   : > { %390 = vst [vmem:[%s1417_s10 + $0xb0] sm:$0xff] %v389_v32  ;;  %392 = vst [vmem:[%s1417_s10 + $0xb8] sm:$0xff] %v391_v33  ;;  %v393_v34 = vld [vmem:[%s1409_s9 + $0x180] sm:$0xff]  ;;  %v395_v35 = vld [vmem:[%s1409_s9 + $0x190] sm:$0xff] }
  0x2b   : > { %v397_v36 = vld [vmem:[%s1409_s9 + $0x1a0] sm:$0xff]  ;;  %394 = vst [vmem:[%s1417_s10 + $0xc0] sm:$0xff] %v393_v34  ;;  %396 = vst [vmem:[%s1417_s10 + $0xc8] sm:$0xff] %v395_v35  ;;  %v399_v37 = vld [vmem:[%s1409_s9 + $0x1b0] sm:$0xff] }
  0x2c   : > { %398 = vst [vmem:[%s1417_s10 + $0xd0] sm:$0xff] %v397_v36  ;;  %v401_v38 = vld [vmem:[%s1409_s9 + $0x1c0] sm:$0xff]  ;;  %v403_v39 = vld [vmem:[%s1409_s9 + $0x1d0] sm:$0xff]  ;;  %400 = vst [vmem:[%s1417_s10 + $0xd8] sm:$0xff] %v399_v37 }
  0x2d   : > { %402 = vst [vmem:[%s1417_s10 + $0xe0] sm:$0xff] %v401_v38  ;;  %404 = vst [vmem:[%s1417_s10 + $0xe8] sm:$0xff] %v403_v39  ;;  %v405_v40 = vld [vmem:[%s1409_s9 + $0x1e0] sm:$0xff]  ;;  %v407_v41 = vld [vmem:[%s1409_s9 + $0x1f0] sm:$0xff] }
  0x2e   : > { %v409_v42 = vld [vmem:[%s1409_s9 + $0x200] sm:$0xff]  ;;  %406 = vst [vmem:[%s1417_s10 + $0xf0] sm:$0xff] %v405_v40  ;;  %408 = vst [vmem:[%s1417_s10 + $0xf8] sm:$0xff] %v407_v41  ;;  %v411_v43 = vld [vmem:[%s1409_s9 + $0x210] sm:$0xff] }
  0x2f   : > { %410 = vst [vmem:[%s1417_s10 + $0x100] sm:$0xff] %v409_v42  ;;  %v413_v44 = vld [vmem:[%s1409_s9 + $0x220] sm:$0xff]  ;;  %v415_v45 = vld [vmem:[%s1409_s9 + $0x230] sm:$0xff]  ;;  %412 = vst [vmem:[%s1417_s10 + $0x108] sm:$0xff] %v411_v43 }
  0x30   : > { %414 = vst [vmem:[%s1417_s10 + $0x110] sm:$0xff] %v413_v44  ;;  %416 = vst [vmem:[%s1417_s10 + $0x118] sm:$0xff] %v415_v45  ;;  %v417_v46 = vld [vmem:[%s1409_s9 + $0x240] sm:$0xff]  ;;  %v419_v47 = vld [vmem:[%s1409_s9 + $0x250] sm:$0xff] }
  0x31   : > { %v421_v48 = vld [vmem:[%s1409_s9 + $0x260] sm:$0xff]  ;;  %418 = vst [vmem:[%s1417_s10 + $0x120] sm:$0xff] %v417_v46  ;;  %420 = vst [vmem:[%s1417_s10 + $0x128] sm:$0xff] %v419_v47  ;;  %v423_v49 = vld [vmem:[%s1409_s9 + $0x270] sm:$0xff] }
  0x32   : > { %422 = vst [vmem:[%s1417_s10 + $0x130] sm:$0xff] %v421_v48  ;;  %424 = vst [vmem:[%s1417_s10 + $0x138] sm:$0xff] %v423_v49 }
  0x33 PF: > { %p1125_p8 = scmp.ge.s32.totalorder %s1325_s16, 1  ;;  %p436_p9 = scmp.lt.s32.totalorder %s1325_s16, 3 }
  0x35   : > { %p437_p10 = pnand %p1125_p8, %p436_p9 }
  0x37   : > { %440 = sbr.rel (%p437_p10) target bundleno = 167 (0xa7), region = 100 }
  0x3e   : > { %s1496_s11 = sand.u32 1, %s1309_s12   ;;  %v1327_v50 = vmov 0.0   ;;  %p482_p11 = scmp.lt.s32.totalorder %s1317_s14, 1 }
  0x3f   : > { %490 = vst [vmem:[#allocation2] sm:$0xff] %v1327_v50  ;;  %491 = vst [vmem:[#allocation2 + $0x8] sm:$0xff] %v1327_v50  ;;  %s1244_s18 = smul.u32 80, %s1496_s11  ;;  %s1126_s28 = sshll.u32 %s1496_s11, 4 }
  0x40   : > { %s1245_s19 = smul.u32 320, %s1496_s11  ;;  %s1825_s29 = scalar_lea.vmem [#allocation5], %s1126_s28 }
  0x41   : > { %s1500_s20 = scalar_lea.vmem [#allocation3], %s1244_s18  ;;  %s1239_s30 = sshll.u32 (%p1387_p6), %s1317_s14, 3 }
  0x42   : > { %v1503_v51 = vld [vmem:[%s1500_s20] sm:$0xff]  ;;  %v1506_v52 = vld [vmem:[%s1500_s20 + $0x8] sm:$0xff]  ;;  %v1509_v53 = vld [vmem:[%s1500_s20 + $0x10] sm:$0xff]  ;;  %s1511_s12 = scalar_lea.vmem [#allocation4], %s1245_s19  ;;  %s983_s6 = scalar_lea.vmem (%p1387_p6), %s1855_s3, %s1239_s30 }
  0x43   : > { %v1514_v54 = vld [vmem:[%s1511_s12] sm:$0xff]  ;;  %v1517_v55 = vld [vmem:[%s1511_s12 + $0x8] sm:$0xff]  ;;  %v1520_v56 = vld [vmem:[%s1511_s12 + $0x10] sm:$0xff]  ;;  %s1792_s21 = scalar_select %p482_p11, %s1317_s14, 1 }
  0x44   : > { %v494_v57 = vmul.f32 %v1514_v54, %v1503_v51  ;;  %v498_v58 = vmul.f32 %v1517_v55, %v1506_v52  ;;  %v502_v59 = vmul.f32 %v1520_v56, %v1509_v53  ;;  %v1529_v60 = vld [vmem:[%s1500_s20 + $0x18] sm:$0xff]  ;;  %v1535_v62 = vld [vmem:[%s1500_s20 + $0x20] sm:$0xff] }
  0x45   : > { %v1532_v61 = vld [vmem:[%s1511_s12 + $0x18] sm:$0xff]  ;;  %v1538_v63 = vld [vmem:[%s1511_s12 + $0x20] sm:$0xff]  ;;  %v1541_v0 = vld [vmem:[%s1511_s12 + $0x28] sm:$0xff]  ;;  %s1127_s24 = sshll.u32 %s1792_s21, 3 }
  0x46   : > { %v1544_v1 = vld [vmem:[%s1511_s12 + $0x30] sm:$0xff]  ;;  %v499_v2 = vadd.f32 %v498_v58, %v494_v57  ;;  %v506_v3 = vmul.f32 %v1532_v61, %v1529_v60  ;;  %v524_v4 = vmul.f32 %v1541_v0, %v1503_v51  ;;  %v1553_v6 = vld [vmem:[%s1511_s12 + $0x38] sm:$0xff]  ;;  %v1556_v7 = vld [vmem:[%s1511_s12 + $0x40] sm:$0xff]  ;;  %v510_v8 = vmul.f32 %v1538_v63, %v1535_v62  ;;  %s485_s27 = scalar_lea.vmem %s1854_s2, %s1127_s24 }
  0x47   : > { %v528_v5 = vmul.f32 %v1544_v1, %v1506_v52  ;;  %v532_v9 = vmul.f32 %v1553_v6, %v1509_v53  ;;  %v1563_v10 = vld [vmem:[%s1511_s12 + $0x48] sm:$0xff]  ;;  %v1566_v11 = vld [vmem:[%s1511_s12 + $0x50] sm:$0xff]  ;;  %v536_v14 = vmul.f32 %v1556_v7, %v1529_v60  ;;  %v1573_v16 = vld [vmem:[%s1511_s12 + $0x58] sm:$0xff] }
  0x48   : > { %v503_v12 = vadd.f32 %v502_v59, %v499_v2  ;;  %v554_v15 = vmul.f32 %v1566_v11, %v1503_v51  ;;  %v1576_v17 = vld [vmem:[%s1511_s12 + $0x60] sm:$0xff]  ;;  %v1579_v18 = vld [vmem:[%s1511_s12 + $0x68] sm:$0xff]  ;;  %v540_v19 = vmul.f32 %v1563_v10, %v1535_v62  ;;  %v558_v20 = vmul.f32 %v1573_v16, %v1506_v52  ;;  %v1590_v23 = vld [vmem:[%s1511_s12 + $0x70] sm:$0xff] }
  0x49   : > { %v529_v13 = vadd.f32 %v528_v5, %v524_v4  ;;  %v562_v21 = vmul.f32 %v1576_v17, %v1509_v53  ;;  %v566_v22 = vmul.f32 %v1579_v18, %v1529_v60  ;;  %v1593_v24 = vld [vmem:[%s1511_s12 + $0x78] sm:$0xff]  ;;  %v570_v27 = vmul.f32 %v1590_v23, %v1535_v62  ;;  %v1600_v29 = vld [vmem:[%s1511_s12 + $0x80] sm:$0xff]  ;;  %v1603_v30 = vld [vmem:[%s1511_s12 + $0x88] sm:$0xff] }
  0x4a   : > { %v507_v25 = vadd.f32 %v506_v3, %v503_v12  ;;  %v584_v28 = vmul.f32 %v1593_v24, %v1503_v51  ;;  %v1606_v31 = vld [vmem:[%s1511_s12 + $0x90] sm:$0xff]  ;;  %v559_v32 = vadd.f32 %v558_v20, %v554_v15  ;;  %v588_v33 = vmul.f32 %v1600_v29, %v1506_v52  ;;  %v1615_v36 = vld [vmem:[%s1511_s12 + $0x98] sm:$0xff]  ;;  %v1618_v37 = vld [vmem:[%s1511_s12 + $0xa0] sm:$0xff] }
  0x4b   : > { %v533_v26 = vadd.f32 %v532_v9, %v529_v13  ;;  %v592_v34 = vmul.f32 %v1603_v30, %v1509_v53  ;;  %v596_v35 = vmul.f32 %v1606_v31, %v1529_v60  ;;  %v600_v40 = vmul.f32 %v1615_v36, %v1535_v62  ;;  %v1625_v42 = vld [vmem:[%s1511_s12 + $0xa8] sm:$0xff]  ;;  %v1628_v43 = vld [vmem:[%s1511_s12 + $0xb0] sm:$0xff]  ;;  %v1631_v44 = vld [vmem:[%s1511_s12 + $0xb8] sm:$0xff] }
  0x4c   : > { %v511_v38 = vadd.f32 %v510_v8, %v507_v25  ;;  %v614_v41 = vmul.f32 %v1618_v37, %v1503_v51  ;;  %v563_v45 = vadd.f32 %v562_v21, %v559_v32  ;;  %v589_v46 = vadd.f32 %v588_v33, %v584_v28  ;;  %v1638_v49 = vld [vmem:[%s1511_s12 + $0xc0] sm:$0xff]  ;;  %v1641_v50 = vld [vmem:[%s1511_s12 + $0xc8] sm:$0xff]  ;;  %v1648_v3 = vld [vmem:[%s1511_s12 + $0xd0] sm:$0xff] }
  0x4d   : > { %v537_v39 = vadd.f32 %v536_v14, %v533_v26  ;;  %v618_v47 = vmul.f32 %v1625_v42, %v1506_v52  ;;  %v622_v48 = vmul.f32 %v1628_v43, %v1509_v53  ;;  %v626_v59 = vmul.f32 %v1631_v44, %v1529_v60  ;;  %v1651_v4 = vld [vmem:[%s1511_s12 + $0xd8] sm:$0xff]  ;;  %v1654_v5 = vld [vmem:[%s1511_s12 + $0xe0] sm:$0xff]  ;;  %v1659_v14 = vld [vmem:[%s1511_s12 + $0xe8] sm:$0xff] }
  0x4e   : > { %v513_v57 = vrot.slane %v511_v38, 4  ;;  %v630_v2 = vmul.f32 %v1638_v49, %v1535_v62  ;;  %v567_v8 = vadd.f32 %v566_v22, %v563_v45  ;;  %v593_v9 = vadd.f32 %v592_v34, %v589_v46  ;;  %v1666_v25 = vld [vmem:[%s1511_s12 + $0xf0] sm:$0xff]  ;;  %v1671_v33 = vld [vmem:[%s1511_s12 + $0xf8] sm:$0xff]  ;;  %v1676_v45 = vld [vmem:[%s1511_s12 + $0x100] sm:$0xff] }
  0x4f   : > { %v541_v58 = vadd.f32 %v540_v19, %v537_v39  ;;  %v619_v12 = vadd.f32 %v618_v47, %v614_v41  ;;  %v644_v13 = vmul.f32 %v1641_v50, %v1503_v51  ;;  %v648_v20 = vmul.f32 %v1648_v3, %v1506_v52  ;;  %1864 = vst [vmem:[#allocation6_spill] sm:$0xff] %v1666_v25 }
  0x50   : > { %v514_v15 = vadd.f32 %v513_v57, %v511_v38  ;;  %v652_v21 = vmul.f32 %v1651_v4, %v1509_v53  ;;  %v571_v26 = vadd.f32 %v570_v27, %v567_v8  ;;  %v597_v22 = vadd.f32 %v596_v35, %v593_v9  ;;  %1865 = vst [vmem:[#allocation7_spill] sm:$0xff] %v1671_v33 }
  0x51   : > { %v543_v19 = vrot.slane %v541_v58, 4  ;;  %v623_v28 = vadd.f32 %v622_v48, %v619_v12  ;;  %v656_v32 = vmul.f32 %v1654_v5, %v1529_v60  ;;  %v649_v39 = vadd.f32 %v648_v20, %v644_v13  ;;  %1866 = vst [vmem:[#allocation8_spill] sm:$0xff] %v1676_v45 }
  0x52   : > { %v515_v34 = vrot.slane %v514_v15, 2  ;;  %v660_v41 = vmul.f32 %v1659_v14, %v1535_v62  ;;  %v573_v46 = vrot.slane %v571_v26, 4  ;;  %v601_v47 = vadd.f32 %v600_v40, %v597_v22 }
  0x53   : > { %v544_v38 = vadd.f32 %v543_v19, %v541_v58  ;;  %v627_v27 = vadd.f32 %v626_v59, %v623_v28  ;;  %v674_v35 = vmul.f32 %v1666_v25, %v1503_v51  ;;  %v653_v8 = vadd.f32 %v652_v21, %v649_v39  ;;  %v1683_v58 = vld [vmem:[%s1511_s12 + $0x108] sm:$0xff]  ;;  %v1688_v25 = vld [vmem:[%s1511_s12 + $0x110] sm:$0xff] }
  0x54   : > { %v516_v48 = vadd.f32 %v515_v34, %v514_v15  ;;  %v678_v9 = vmul.f32 %v1671_v33, %v1506_v52  ;;  %1867 = vst [vmem:[#allocation9_spill] sm:$0xff] %v1683_v58  ;;  %v574_v12 = vadd.f32 %v573_v46, %v571_v26  ;;  %v603_v13 = vrot.slane %v601_v47, 4  ;;  %v512_v15 = vld [vmem:[#allocation2] sm:$0x1] }
  0x55   : > { %v545_v57 = vrot.slane %v544_v38, 2  ;;  %v631_v19 = vadd.f32 %v630_v2, %v627_v27  ;;  %v682_v40 = vmul.f32 %v1676_v45, %v1509_v53  ;;  %v657_v22 = vadd.f32 %v656_v32, %v653_v8  ;;  %v1693_v45 = vld [vmem:[%s1511_s12 + $0x118] sm:$0xff]  ;;  %v542_v32 = vld [vmem:[#allocation2 + $0x1] sm:$0x1] }
  0x56   : > { %v517_v20 = vrot.slane %v516_v48, 1  ;;  %v679_v28 = vadd.f32 %v678_v9, %v674_v35  ;;  %v575_v21 = vrot.slane %v574_v12, 2  ;;  %v604_v34 = vadd.f32 %v603_v13, %v601_v47  ;;  %v1698_v47 = vld [vmem:[%s1511_s12 + $0x120] sm:$0xff] }
  0x57   : > { %v546_v59 = vadd.f32 %v545_v57, %v544_v38  ;;  %v633_v39 = vrot.slane %v631_v19, 4  ;;  %v686_v26 = vmul.f32 %v1683_v58, %v1529_v60  ;;  %v661_v27 = vadd.f32 %v660_v41, %v657_v22 }
  0x58   : > { %v518_v2 = vadd.f32 %v517_v20, %v516_v48  ;;  %v683_v33 = vadd.f32 %v682_v40, %v679_v28  ;;  %v576_v38 = vadd.f32 %v575_v21, %v574_v12  ;;  %v605_v35 = vrot.slane %v604_v34, 2  ;;  %v1701_v20 = vld [vmem:[%s1511_s12 + $0x128] sm:$0xff]  ;;  %v572_v21 = vld [vmem:[#allocation2 + $0x2] sm:$0x1] }
  0x59   : > { %v547_v46 = vrot.slane %v546_v59, 1  ;;  %v634_v57 = vadd.f32 %v633_v39, %v631_v19  ;;  %v690_v8 = vmul.f32 %v1688_v25, %v1535_v62  ;;  %v663_v58 = vrot.slane %v661_v27, 4  ;;  %1868 = vst [vmem:[#allocation10_spill] sm:$0xff] %v1701_v20  ;;  %v1706_v19 = vld [vmem:[%s1511_s12 + $0x130] sm:$0xff]  ;;  %v1711_v39 = vld [vmem:[%s1511_s12 + $0x138] sm:$0xff] }
  0x5a   : > { %v519_v9 = vadd.f32 %v518_v2, %v512_v15  ;;  %v687_v48 = vadd.f32 %v686_v26, %v683_v33  ;;  %v577_v41 = vrot.slane %v576_v38, 1  ;;  %v606_v40 = vadd.f32 %v605_v35, %v604_v34  ;;  %1869 = vst [vmem:[#allocation11_spill] sm:$0xff] %v1706_v19 }
  0x5b   : > { %v548_v13 = vadd.f32 %v547_v46, %v546_v59  ;;  %v635_v22 = vrot.slane %v634_v57, 2  ;;  %v704_v12 = vmul.f32 %v1693_v45, %v1503_v51  ;;  %v664_v15 = vadd.f32 %v663_v58, %v661_v27  ;;  %v1716_v46 = vld [vmem:[%s1500_s20 + $0x28] sm:$0xff] }
  0x5c   : > { %520 = vst [vmem:[#allocation2] sm:$0x1] %v519_v9  ;;  %v691_v59 = vadd.f32 %v690_v8, %v687_v48  ;;  %v708_v33 = vmul.f32 %v1698_v47, %v1506_v52  ;;  %v578_v26 = vadd.f32 %v577_v41, %v576_v38  ;;  %v607_v34 = vrot.slane %v606_v40, 1  ;;  %v1721_v8 = vld [vmem:[%s1500_s20 + $0x30] sm:$0xff]  ;;  %v1724_v38 = vld [vmem:[%s1500_s20 + $0x38] sm:$0xff]  ;;  %v1729_v48 = vld [vmem:[%s1500_s20 + $0x40] sm:$0xff] }
  0x5d   : > { %v549_v28 = vadd.f32 %v548_v13, %v542_v32  ;;  %v636_v2 = vadd.f32 %v635_v22, %v634_v57  ;;  %v712_v51 = vmul.f32 %v1701_v20, %v1509_v53  ;;  %v602_v32 = vld [vmem:[#allocation2 + $0x3] sm:$0x1]  ;;  %v665_v35 = vrot.slane %v664_v15, 2  ;;  %v632_v41 = vld [vmem:[#allocation2 + $0x4] sm:$0x1] }
  0x5e   : > { %v693_v58 = vrot.slane %v691_v59, 4  ;;  %v709_v27 = vadd.f32 %v708_v33, %v704_v12  ;;  %v716_v52 = vmul.f32 %v1706_v19, %v1529_v60  ;;  %v579_v9 = vadd.f32 %v578_v26, %v572_v21  ;;  %v1734_v60 = vld [vmem:[%s1500_s20 + $0x48] sm:$0xff] }
  0x5f   : > { %550 = vst [vmem:[#allocation2 + $0x1] sm:$0x1] %v549_v28  ;;  %v608_v57 = vadd.f32 %v607_v34, %v606_v40  ;;  %v637_v13 = vrot.slane %v636_v2, 1  ;;  %v720_v53 = vmul.f32 %v1711_v39, %v1535_v62  ;;  %v666_v22 = vadd.f32 %v665_v35, %v664_v15 }
  0x60   : > { %v694_v28 = vadd.f32 %v693_v58, %v691_v59  ;;  %v713_v20 = vadd.f32 %v712_v51, %v709_v27  ;;  %v734_v12 = vmul.f32 %v1716_v46, %v1514_v54  ;;  %580 = vst [vmem:[#allocation2 + $0x2] sm:$0x1] %v579_v9  ;;  %v738_v40 = vmul.f32 %v1721_v8, %v1517_v55  ;;  %v662_v54 = vld [vmem:[#allocation2 + $0x5] sm:$0x1] }
  0x61   : > { %v609_v33 = vadd.f32 %v608_v57, %v602_v32  ;;  %v638_v19 = vadd.f32 %v637_v13, %v636_v2  ;;  %v742_v62 = vmul.f32 %v1724_v38, %v1520_v56  ;;  %v667_v21 = vrot.slane %v666_v22, 1  ;;  %v692_v57 = vld [vmem:[#allocation2 + $0x6] sm:$0x1] }
  0x62   : > { %v695_v26 = vrot.slane %v694_v28, 2  ;;  %v717_v34 = vadd.f32 %v716_v52, %v713_v20  ;;  %v746_v15 = vmul.f32 %v1729_v48, %v1532_v61  ;;  %v739_v51 = vadd.f32 %v738_v40, %v734_v12 }
  0x63   : > { %610 = vst [vmem:[#allocation2 + $0x3] sm:$0x1] %v609_v33  ;;  %v639_v59 = vadd.f32 %v638_v19, %v632_v41  ;;  %v750_v32 = vmul.f32 %v1734_v60, %v1538_v63  ;;  %v764_v2 = vmul.f32 %v1716_v46, %v1541_v0  ;;  %v668_v55 = vadd.f32 %v667_v21, %v666_v22 }
  0x64   : > { %v696_v35 = vadd.f32 %v695_v26, %v694_v28  ;;  %v721_v58 = vadd.f32 %v720_v53, %v717_v34  ;;  %v768_v56 = vmul.f32 %v1721_v8, %v1544_v1  ;;  %v743_v20 = vadd.f32 %v742_v62, %v739_v51 }
  0x65   : > { %640 = vst [vmem:[#allocation2 + $0x4] sm:$0x1] %v639_v59  ;;  %v772_v61 = vmul.f32 %v1724_v38, %v1553_v6  ;;  %v776_v19 = vmul.f32 %v1729_v48, %v1556_v7  ;;  %v780_v63 = vmul.f32 %v1734_v60, %v1563_v10  ;;  %v669_v27 = vadd.f32 %v668_v55, %v662_v54 }
  0x66   : > { %v697_v52 = vrot.slane %v696_v35, 1  ;;  %v723_v0 = vrot.slane %v721_v58, 4  ;;  %v769_v9 = vadd.f32 %v768_v56, %v764_v2  ;;  %v747_v13 = vadd.f32 %v746_v15, %v743_v20 }
  0x67   : > { %v793_v1 = vmul.f32 %v1716_v46, %v1566_v11  ;;  %v797_v53 = vmul.f32 %v1721_v8, %v1573_v16  ;;  %v801_v6 = vmul.f32 %v1724_v38, %v1576_v17  ;;  %670 = vst [vmem:[#allocation2 + $0x5] sm:$0x1] %v669_v27  ;;  %v805_v10 = vmul.f32 %v1729_v48, %v1579_v18 }
  0x68   : > { %v698_v7 = vadd.f32 %v697_v52, %v696_v35  ;;  %v724_v41 = vadd.f32 %v723_v0, %v721_v58  ;;  %v773_v22 = vadd.f32 %v772_v61, %v769_v9  ;;  %v751_v28 = vadd.f32 %v750_v32, %v747_v13  ;;  %v722_v35 = vld [vmem:[#allocation2 + $0x7] sm:$0x1] }
  0x69   : > { %v798_v12 = vadd.f32 %v797_v53, %v793_v1  ;;  %v809_v33 = vmul.f32 %v1734_v60, %v1590_v23  ;;  %v822_v11 = vmul.f32 %v1716_v46, %v1593_v24  ;;  %v826_v17 = vmul.f32 %v1721_v8, %v1600_v29 }
  0x6a   : > { %v699_v40 = vadd.f32 %v698_v7, %v692_v57  ;;  %v725_v16 = vrot.slane %v724_v41, 2  ;;  %v777_v62 = vadd.f32 %v776_v19, %v773_v22  ;;  %v754_v21 = vrot.slane %v751_v28, 4 }
  0x6b   : > { %v802_v26 = vadd.f32 %v801_v6, %v798_v12  ;;  %v830_v18 = vmul.f32 %v1724_v38, %v1603_v30  ;;  %v834_v34 = vmul.f32 %v1729_v48, %v1606_v31  ;;  %v827_v59 = vadd.f32 %v826_v17, %v822_v11  ;;  %v753_v6 = vld [vmem:[#allocation2 + $0x8] sm:$0x1]  ;;  %v782_v17 = vld [vmem:[#allocation2 + $0x9] sm:$0x1] }
  0x6c   : > { %700 = vst [vmem:[#allocation2 + $0x6] sm:$0x1] %v699_v40  ;;  %v726_v23 = vadd.f32 %v725_v16, %v724_v41  ;;  %v781_v15 = vadd.f32 %v780_v63, %v777_v62  ;;  %v838_v24 = vmul.f32 %v1734_v60, %v1615_v36  ;;  %v755_v54 = vadd.f32 %v754_v21, %v751_v28  ;;  %v1870_v16 = vld [vmem:[#allocation6_spill] sm:$0xff] }
  0x6d   : > { %v806_v51 = vadd.f32 %v805_v10, %v802_v26  ;;  %v851_v29 = vmul.f32 %v1716_v46, %v1618_v37  ;;  %v855_v32 = vmul.f32 %v1721_v8, %v1625_v42  ;;  %v831_v55 = vadd.f32 %v830_v18, %v827_v59  ;;  %v1871_v18 = vld [vmem:[#allocation7_spill] sm:$0xff]  ;;  %v1872_v59 = vld [vmem:[#allocation8_spill] sm:$0xff] }
  0x6e   : > { %v727_v2 = vrot.slane %v726_v23, 1  ;;  %v783_v30 = vrot.slane %v781_v15, 4  ;;  %v859_v31 = vmul.f32 %v1724_v38, %v1628_v43  ;;  %v756_v58 = vrot.slane %v755_v54, 2 }
  0x6f   : > { %v810_v36 = vadd.f32 %v809_v33, %v806_v51  ;;  %v856_v56 = vadd.f32 %v855_v32, %v851_v29  ;;  %v863_v20 = vmul.f32 %v1729_v48, %v1631_v44  ;;  %v835_v19 = vadd.f32 %v834_v34, %v831_v55  ;;  %v1873_v29 = vld [vmem:[#allocation9_spill] sm:$0xff] }
  0x70   : > { %v728_v37 = vadd.f32 %v727_v2, %v726_v23  ;;  %v784_v61 = vadd.f32 %v783_v30, %v781_v15  ;;  %v867_v42 = vmul.f32 %v1734_v60, %v1638_v49  ;;  %v757_v63 = vadd.f32 %v756_v58, %v755_v54  ;;  %v811_v30 = vld [vmem:[#allocation2 + $0xa] sm:$0x1] }
  0x71   : > { %v812_v27 = vrot.slane %v810_v36, 4  ;;  %v860_v52 = vadd.f32 %v859_v31, %v856_v56  ;;  %v880_v43 = vmul.f32 %v1716_v46, %v1641_v50  ;;  %v839_v57 = vadd.f32 %v838_v24, %v835_v19 }
  0x72   : > { %v729_v0 = vadd.f32 %v728_v37, %v722_v35  ;;  %v785_v9 = vrot.slane %v784_v61, 2  ;;  %v884_v13 = vmul.f32 %v1721_v8, %v1648_v3  ;;  %v758_v44 = vrot.slane %v757_v63, 1 }
  0x73   : > { %v813_v1 = vadd.f32 %v812_v27, %v810_v36  ;;  %v864_v53 = vadd.f32 %v863_v20, %v860_v52  ;;  %v888_v49 = vmul.f32 %v1724_v38, %v1651_v4  ;;  %v841_v50 = vrot.slane %v839_v57, 4  ;;  %v970_v52 = vld [vmem:[%s485_s27] sm:$0xff] }
  0x74   : > { %730 = vst [vmem:[#allocation2 + $0x7] sm:$0x1] %v729_v0  ;;  %v786_v7 = vadd.f32 %v785_v9, %v784_v61  ;;  %v885_v41 = vadd.f32 %v884_v13, %v880_v43  ;;  %v892_v22 = vmul.f32 %v1729_v48, %v1654_v5  ;;  %v759_v10 = vadd.f32 %v758_v44, %v757_v63 }
  0x75   : > { %v814_v3 = vrot.slane %v813_v1, 2  ;;  %v868_v28 = vadd.f32 %v867_v42, %v864_v53  ;;  %v896_v12 = vmul.f32 %v1734_v60, %v1659_v14  ;;  %v842_v11 = vadd.f32 %v841_v50, %v839_v57  ;;  %v1874_v42 = vld [vmem:[#allocation10_spill] sm:$0xff] }
  0x76   : > { %v787_v33 = vrot.slane %v786_v7, 1  ;;  %v889_v40 = vadd.f32 %v888_v49, %v885_v41  ;;  %v909_v4 = vmul.f32 %v1716_v46, %v1870_v16  ;;  %v760_v62 = vadd.f32 %v759_v10, %v753_v6 }
  0x77   : > { %v815_v21 = vadd.f32 %v814_v3, %v813_v1  ;;  %v870_v26 = vrot.slane %v868_v28, 4  ;;  %v913_v5 = vmul.f32 %v1721_v8, %v1871_v18  ;;  %v843_v23 = vrot.slane %v842_v11, 2 }
  0x78   : > { %v788_v34 = vadd.f32 %v787_v33, %v786_v7  ;;  %v893_v15 = vadd.f32 %v892_v22, %v889_v40  ;;  %v917_v14 = vmul.f32 %v1724_v38, %v1872_v59  ;;  %761 = vst [vmem:[#allocation2 + $0x8] sm:$0x1] %v760_v62  ;;  %v921_v32 = vmul.f32 %v1729_v48, %v1873_v29  ;;  %v898_v33 = vld [vmem:[#allocation2 + $0xd] sm:$0x1] }
  0x79   : > { %v816_v24 = vrot.slane %v815_v21, 1  ;;  %v871_v54 = vadd.f32 %v870_v26, %v868_v28  ;;  %v914_v51 = vadd.f32 %v913_v5, %v909_v4  ;;  %v844_v55 = vadd.f32 %v843_v23, %v842_v11  ;;  %v956_v23 = vld [vmem:[#allocation2 + $0xf] sm:$0x1] }
  0x7a   : > { %v789_v2 = vadd.f32 %v788_v34, %v782_v17  ;;  %v897_v31 = vadd.f32 %v896_v12, %v893_v15  ;;  %v925_v35 = vmul.f32 %v1734_v60, %v1688_v25  ;;  %v938_v20 = vmul.f32 %v1716_v46, %v1693_v45  ;;  %v840_v25 = vld [vmem:[#allocation2 + $0xb] sm:$0x1]  ;;  %v1875_v45 = vld [vmem:[#allocation11_spill] sm:$0xff]  ;;  %v927_v17 = vld [vmem:[#allocation2 + $0xe] sm:$0x1] }
  0x7b   : > { %v817_v58 = vadd.f32 %v816_v24, %v815_v21  ;;  %v872_v36 = vrot.slane %v871_v54, 2  ;;  %v918_v56 = vadd.f32 %v917_v14, %v914_v51  ;;  %v845_v37 = vrot.slane %v844_v55, 1  ;;  %v968_v27 = vld [vmem:[#allocation2] sm:$0xff] }
  0x7c   : > { %790 = vst [vmem:[#allocation2 + $0x9] sm:$0x1] %v789_v2  ;;  %v899_v61 = vrot.slane %v897_v31, 4  ;;  %v942_v19 = vmul.f32 %v1721_v8, %v1698_v47  ;;  %v946_v63 = vmul.f32 %v1724_v38, %v1874_v42  ;;  %v950_v46 = vmul.f32 %v1729_v48, %v1875_v45  ;;  %v869_v8 = vld [vmem:[#allocation2 + $0xc] sm:$0x1] }
  0x7d   : > { %v818_v43 = vadd.f32 %v817_v58, %v811_v30  ;;  %v873_v0 = vadd.f32 %v872_v36, %v871_v54  ;;  %v922_v9 = vadd.f32 %v921_v32, %v918_v56  ;;  %v846_v57 = vadd.f32 %v845_v37, %v844_v55 }
  0x7e   : > { %v900_v13 = vadd.f32 %v899_v61, %v897_v31  ;;  %v943_v44 = vadd.f32 %v942_v19, %v938_v20  ;;  %v971_v49 = vadd.f32 %v970_v52, %v968_v27  ;;  %v954_v7 = vmul.f32 %v1734_v60, %v1711_v39 }
  0x7f   : > { %819 = vst [vmem:[#allocation2 + $0xa] sm:$0x1] %v818_v43  ;;  %v874_v1 = vrot.slane %v873_v0, 1  ;;  %v926_v53 = vadd.f32 %v925_v35, %v922_v9  ;;  %v847_v47 = vadd.f32 %v846_v57, %v840_v25 }
  0x80   : > { %v901_v6 = vrot.slane %v900_v13, 2  ;;  %v947_v38 = vadd.f32 %v946_v63, %v943_v44  ;;  %973 = vst [vmem:[%s1825_s29] sm:$0xff] %v971_v49 }
  0x81   : > { %v875_v50 = vadd.f32 %v874_v1, %v873_v0  ;;  %v928_v41 = vrot.slane %v926_v53, 4  ;;  %848 = vst [vmem:[#allocation2 + $0xb] sm:$0x1] %v847_v47 }
  0x82   : > { %v902_v22 = vadd.f32 %v901_v6, %v900_v13  ;;  %v951_v48 = vadd.f32 %v950_v46, %v947_v38 }
  0x83   : > { %v876_v10 = vadd.f32 %v875_v50, %v869_v8  ;;  %v929_v3 = vadd.f32 %v928_v41, %v926_v53 }
  0x84   : > { %v903_v28 = vrot.slane %v902_v22, 1  ;;  %v955_v12 = vadd.f32 %v954_v7, %v951_v48 }
  0x85   : > { %877 = vst [vmem:[#allocation2 + $0xc] sm:$0x1] %v876_v10  ;;  %v930_v11 = vrot.slane %v929_v3, 2 }
  0x86   : > { %v904_v40 = vadd.f32 %v903_v28, %v902_v22  ;;  %v957_v16 = vrot.slane %v955_v12, 4 }
  0x87   : > { %v931_v4 = vadd.f32 %v930_v11, %v929_v3  ;;  %v1013_v54 = vld [vmem:[%s1825_s29] sm:$0xff] (%p1387_p6) }
  0x88   : > { %v905_v39 = vadd.f32 %v904_v40, %v898_v33  ;;  %v958_v60 = vadd.f32 %v957_v16, %v955_v12  ;;  %1014 = vst [vmem:[%s983_s6] sm:$0xff] (%p1387_p6), %v1013_v54 }
  0x89   : > { %v932_v62 = vrot.slane %v931_v4, 1 }
  0x8a   : > { %906 = vst [vmem:[#allocation2 + $0xd] sm:$0x1] %v905_v39  ;;  %v959_v21 = vrot.slane %v958_v60, 2 }
  0x8b   : > { %v933_v26 = vadd.f32 %v932_v62, %v931_v4 }
  0x8c   : > { %v960_v18 = vadd.f32 %v959_v21, %v958_v60 }
  0x8d   : > { %v934_v5 = vadd.f32 %v933_v26, %v927_v17 }
  0x8e   : > { %v961_v34 = vrot.slane %v960_v18, 1 }
  0x8f   : > { %935 = vst [vmem:[#allocation2 + $0xe] sm:$0x1] %v934_v5 }
  0x90   : > { %v962_v15 = vadd.f32 %v961_v34, %v960_v18 }
  0x92   : > { %v963_v59 = vadd.f32 %v962_v15, %v956_v23 }
  0x94   : > { %964 = vst [vmem:[#allocation2 + $0xf] sm:$0x1] %v963_v59 }
  0x98   : > { %981 = sbr.rel (!%p1387_p6) target bundleno = 167 (0xa7), region = 120 }
  0x9b   : > { %v969_v14 = vld [vmem:[#allocation2 + $0x8] sm:$0xff] }
  0x9c   : > { %v972_v24 = vadd.f32 %v970_v52, %v969_v14 }
  0x9e   : > { %974 = vst [vmem:[%s1825_s29 + $0x8] sm:$0xff] %v972_v24 }
  0xa5   : > { %v1015_v51 = vld [vmem:[%s1825_s29 + $0x8] sm:$0xff] }
  0xa6   : > { %1016 = vst [vmem:[%s983_s6 + $0x10] sm:$0xff] %v1015_v51 }
  0xa7 PF: > { %s13_s16 = sadd.s32 1, %s1325_s16   ;;  %s1876_s12 = smov %s1313_s13 }
  0xa8   : > { %p10_p12 = scmp.ge.s32.totalorder %s13_s16, 4   ;;  %s1877_s13 = smov %s1392_s23 }
  0xa9   : > { %s1878_s14 = smov %s1321_s15  ;;  %s1879_s15 = smov %s1881_s17 }
  0xaa   :  { %12 = sbr.rel (!%p10_p12) target bundleno = 3 (0x3), region = 209 }

</bundles_post_ra>
